<compile_context>
chip_gen: v6e
topology: v6e:2x2x1
jax: 0.10.0
libtpu: 0.0.40
codegen_flags: <defaults>
</compile_context>

<pallas_src>
import jax
import jax.numpy as jnp
from jax import lax
from jax.experimental import pallas as pl
from jax.experimental.pallas import tpu as pltpu

EPS = 1e-5
LANE = 128            # channel axes padded to multiples of the TPU lane width
ROW_TILE_CAP = 512    # rows per grid step (multiple of 8)
VMEM_LIMIT = 32 * 1024 * 1024


# ---------------------------------------------------------------------------
# small shape helpers (wrapper-side layout plumbing only)
# ---------------------------------------------------------------------------
def _round_up(x, m):
    return ((x + m - 1) // m) * m


def _choose_tile(m, cap=ROW_TILE_CAP):
    tile = min(cap, _round_up(max(m, 1), 8))
    return tile, _round_up(m, tile)


def _pad_last(a, target):
    pad = target - a.shape[-1]
    if pad == 0:
        return a
    return jnp.pad(a, [(0, 0)] * (a.ndim - 1) + [(0, pad)])


def _pad_rows(a2d, target):
    pad = target - a2d.shape[0]
    if pad == 0:
        return a2d
    return jnp.pad(a2d, ((0, pad), (0, 0)))


def _pad_mid(a3d, target):
    pad = target - a3d.shape[1]
    if pad == 0:
        return a3d
    return jnp.pad(a3d, ((0, 0), (0, pad), (0, 0)))


def _pad2d(w, rows, cols):
    return jnp.pad(w, ((0, rows - w.shape[0]), (0, cols - w.shape[1])))


def _compiler_params(semantics):
    return pltpu.CompilerParams(dimension_semantics=semantics,
                                vmem_limit_bytes=VMEM_LIMIT)


def _scale_shift(s, ss, g, b, count):
    # training-mode BN folded to per-channel scale/shift (tiny (1,C) wrapper math)
    mean = s / count
    var = jnp.maximum(ss / count - mean * mean, 0.0)
    scale = g * lax.rsqrt(var + EPS)
    shift = b - mean * scale
    return scale, shift


# ---------------------------------------------------------------------------
# Pallas kernels
# ---------------------------------------------------------------------------
def _bn_stats_kernel(x_ref, sum_ref, sq_ref):
    # Grid-accumulated per-channel sum / sum-of-squares over the row axis.
    # (padded rows of x are exactly zero, so they do not perturb the sums)
    x = x_ref[...]
    s = jnp.sum(x, axis=0, keepdims=True)
    ss = jnp.sum(x * x, axis=0, keepdims=True)

    @pl.when(pl.program_id(0) == 0)
    def _():
        sum_ref[...] = s
        sq_ref[...] = ss

    @pl.when(pl.program_id(0) != 0)
    def _():
        sum_ref[...] += s
        sq_ref[...] += ss


def _make_conv1x1_kernel(n_rows, compute_stats):
    # Fused BN(scale/shift) + ReLU + 1x1-conv matmul (+ bias).
    # If compute_stats: also accumulate per-channel sum / sum-of-squares of the
    # conv output across the row grid (padded rows masked out), so the next
    # BatchNorm never needs a separate HBM pass over this tensor.
    def kernel(x_ref, scale_ref, shift_ref, w_ref, bias_ref, o_ref, *stat_refs):
        xb = jnp.maximum(x_ref[...] * scale_ref[...] + shift_ref[...], 0.0)
        y = (jnp.dot(xb, w_ref[...], preferred_element_type=jnp.float32)
             + bias_ref[...])
        o_ref[...] = y
        if compute_stats:
            sum_ref, sq_ref = stat_refs
            i = pl.program_id(0)
            tile_rows = y.shape[0]
            row = i * tile_rows + lax.broadcasted_iota(jnp.int32, (tile_rows, 1), 0)
            ym = jnp.where(row < n_rows, y, 0.0)
            s = jnp.sum(ym, axis=0, keepdims=True)
            ss = jnp.sum(ym * ym, axis=0, keepdims=True)

            @pl.when(i == 0)
            def _():
                sum_ref[...] = s
                sq_ref[...] = ss

            @pl.when(i != 0)
            def _():
                sum_ref[...] += s
                sq_ref[...] += ss
    return kernel


def _make_conv3x3_kernel(n_rows, n_taps):
    # Fused BN + ReLU + 3x3 conv: one shifted-tap matmul per grid step,
    # accumulated in a VMEM f32 scratch ("arbitrary" tap axis, pl.when
    # init/finalize).  Output BN statistics are accumulated across row tiles
    # at the last tap (padded rows masked out).
    def kernel(x_ref, scale_ref, shift_ref, w_ref, bias_ref,
               o_ref, sum_ref, sq_ref, acc_ref):
        i = pl.program_id(0)
        t = pl.program_id(1)
        xb = jnp.maximum(x_ref[...] * scale_ref[...] + shift_ref[...], 0.0)

        @pl.when(jnp.logical_and(i == 0, t == 0))
        def _():
            sum_ref[...] = jnp.zeros_like(sum_ref)
            sq_ref[...] = jnp.zeros_like(sq_ref)

        @pl.when(t == 0)
        def _():
            acc_ref[...] = jnp.zeros_like(acc_ref)

        acc_ref[...] += jnp.dot(xb, w_ref[...],
                                preferred_element_type=jnp.float32)

        @pl.when(t == n_taps - 1)
        def _():
            y = acc_ref[...] + bias_ref[...]
            o_ref[...] = y
            tile_rows = y.shape[0]
            row = i * tile_rows + lax.broadcasted_iota(jnp.int32, (tile_rows, 1), 0)
            ym = jnp.where(row < n_rows, y, 0.0)
            sum_ref[...] += jnp.sum(ym, axis=0, keepdims=True)
            sq_ref[...] += jnp.sum(ym * ym, axis=0, keepdims=True)
    return kernel


def _shortcut_kernel(x_ref, scale_ref, shift_ref, w_ref, bias_ref,
                     main_ref, o_ref):
    # Fused BN + ReLU + 1x1 conv + residual add (main path fused in the epilogue).
    xb = jnp.maximum(x_ref[...] * scale_ref[...] + shift_ref[...], 0.0)
    y = (jnp.dot(xb, w_ref[...], preferred_element_type=jnp.float32)
         + bias_ref[...])
    o_ref[...] = y + main_ref[...]   # broadcasts when main block is (1, C)


# ---------------------------------------------------------------------------
# pallas_call wrappers
# ---------------------------------------------------------------------------
def bn_channel_sums(x2d):
    m, c = x2d.shape
    tile, mpad = _choose_tile(m)
    xp = _pad_rows(x2d, mpad)          # zero rows do not perturb the sums
    return pl.pallas_call(
        _bn_stats_kernel,
        out_shape=(jax.ShapeDtypeStruct((1, c), jnp.float32),
                   jax.ShapeDtypeStruct((1, c), jnp.float32)),
        grid=(mpad // tile,),
        in_specs=[pl.BlockSpec((tile, c), lambda i: (i, 0))],
        out_specs=(pl.BlockSpec((1, c), lambda i: (0, 0)),
                   pl.BlockSpec((1, c), lambda i: (0, 0))),
        compiler_params=_compiler_params(("arbitrary",)),
    )(xp)


def fused_bn_conv1x1(xs4, scale, shift, w2d, bias, *, compute_stats):
    # xs4 is already stride-sliced (NHWC, channel-padded).
    n, ho, wo, cin = xs4.shape
    cout = w2d.shape[1]
    m = n * ho * wo
    tile, mpad = _choose_tile(m)
    a = _pad_rows(xs4.reshape(m, cin), mpad)

    if compute_stats:
        out_shape = (jax.ShapeDtypeStruct((mpad, cout), jnp.float32),
                     jax.ShapeDtypeStruct((1, cout), jnp.float32),
                     jax.ShapeDtypeStruct((1, cout), jnp.float32))
        out_specs = (pl.BlockSpec((tile, cout), lambda i: (i, 0)),
                     pl.BlockSpec((1, cout), lambda i: (0, 0)),
                     pl.BlockSpec((1, cout), lambda i: (0, 0)))
        semantics = ("arbitrary",)       # stats accumulate across row tiles
    else:
        out_shape = jax.ShapeDtypeStruct((mpad, cout), jnp.float32)
        out_specs = pl.BlockSpec((tile, cout), lambda i: (i, 0))
        semantics = ("parallel",)

    res = pl.pallas_call(
        _make_conv1x1_kernel(m, compute_stats),
        out_shape=out_shape,
        grid=(mpad // tile,),
        in_specs=[
            pl.BlockSpec((tile, cin), lambda i: (i, 0)),
            pl.BlockSpec((1, cin), lambda i: (0, 0)),
            pl.BlockSpec((1, cin), lambda i: (0, 0)),
            pl.BlockSpec((cin, cout), lambda i: (0, 0)),
            pl.BlockSpec((1, cout), lambda i: (0, 0)),
        ],
        out_specs=out_specs,
        compiler_params=_compiler_params(semantics),
    )(a, scale, shift, w2d, bias)

    if compute_stats:
        y, s, ss = res
        return y[:m].reshape(n, ho, wo, cout), s, ss
    return res[:m].reshape(n, ho, wo, cout)


def fused_bn_conv3x3(x4, scale, shift, w_taps, bias, stride, kh=3, kw=3):
    n, h, w, cin = x4.shape
    cout = w_taps.shape[-1]
    ho = (h - kh) // stride + 1
    wo = (w - kw) // stride + 1
    m = n * ho * wo
    tile, mpad = _choose_tile(m)
    # shifted / strided tap views (wrapper-side layout plumbing)
    taps = jnp.stack(
        [_pad_rows(
            x4[:, i:i + stride * (ho - 1) + 1:stride,
                  j:j + stride * (wo - 1) + 1:stride, :].reshape(m, cin),
            mpad)
         for i in range(kh) for j in range(kw)], axis=0)
    n_taps = kh * kw
    y, s, ss = pl.pallas_call(
        _make_conv3x3_kernel(m, n_taps),
        out_shape=(jax.ShapeDtypeStruct((mpad, cout), jnp.float32),
                   jax.ShapeDtypeStruct((1, cout), jnp.float32),
                   jax.ShapeDtypeStruct((1, cout), jnp.float32)),
        grid=(mpad // tile, n_taps),
        in_specs=[
            pl.BlockSpec((None, tile, cin), lambda i, t: (t, i, 0)),
            pl.BlockSpec((1, cin), lambda i, t: (0, 0)),
            pl.BlockSpec((1, cin), lambda i, t: (0, 0)),
            pl.BlockSpec((None, cin, cout), lambda i, t: (t, 0, 0)),
            pl.BlockSpec((1, cout), lambda i, t: (0, 0)),
        ],
        out_specs=(pl.BlockSpec((tile, cout), lambda i, t: (i, 0)),
                   pl.BlockSpec((1, cout), lambda i, t: (0, 0)),
                   pl.BlockSpec((1, cout), lambda i, t: (0, 0))),
        scratch_shapes=[pltpu.VMEM((tile, cout), jnp.float32)],
        compiler_params=_compiler_params(("arbitrary", "arbitrary")),
    )(taps, scale, shift, w_taps, bias)
    return y[:m].reshape(n, ho, wo, cout), s, ss


def fused_shortcut_conv_add(xs4, scale, shift, w2d, bias, main4):
    n, hs, ws_, cin = xs4.shape
    cout = w2d.shape[1]
    ps = hs * ws_
    _, hm, wm, _ = main4.shape
    pm = hm * wm
    tile, ppad = _choose_tile(ps)
    xs3 = _pad_mid(xs4.reshape(n, ps, cin), ppad)
    if pm == ps:
        main3 = _pad_mid(main4.reshape(n, ps, cout), ppad)
        main_spec = pl.BlockSpec((None, tile, cout), lambda b, i: (b, i, 0))
    elif pm == 1:
        main3 = main4.reshape(n, 1, cout)
        main_spec = pl.BlockSpec((None, 1, cout), lambda b, i: (b, 0, 0))
    else:
        # TODO(synk): other broadcast patterns of the (already degenerate)
        # reference `out += shortcut(x)` are not supported.
        raise NotImplementedError("unsupported residual broadcast pattern")
    out = pl.pallas_call(
        _shortcut_kernel,
        out_shape=jax.ShapeDtypeStruct((n, ppad, cout), jnp.float32),
        grid=(n, ppad // tile),
        in_specs=[
            pl.BlockSpec((None, tile, cin), lambda b, i: (b, i, 0)),
            pl.BlockSpec((1, cin), lambda b, i: (0, 0)),
            pl.BlockSpec((1, cin), lambda b, i: (0, 0)),
            pl.BlockSpec((cin, cout), lambda b, i: (0, 0)),
            pl.BlockSpec((1, cout), lambda b, i: (0, 0)),
            main_spec,
        ],
        out_specs=pl.BlockSpec((None, tile, cout), lambda b, i: (b, i, 0)),
        compiler_params=_compiler_params(("parallel", "parallel")),
    )(xs3, scale, shift, w2d, bias, main3)
    return out[:, :ps, :].reshape(n, hs, ws_, cout)


# ---------------------------------------------------------------------------
# Full block forward
# ---------------------------------------------------------------------------
def preact_bottleneck_forward(x_nchw, p, stride):
    x = jnp.transpose(x_nchw, (0, 2, 3, 1)).astype(jnp.float32)  # NHWC
    n, h, w, cin = x.shape
    cout1 = p["conv1_w"].shape[0]
    cexp = p["conv3_w"].shape[0]

    cin_p = _round_up(cin, LANE)
    c1_p = _round_up(cout1, LANE)
    cexp_p = _round_up(cexp, LANE)

    # lane-dense channel padding; padded channels are inert (zeros throughout)
    x4 = _pad_last(x, cin_p)

    def vec(v, cp):
        return _pad_last(v.reshape(1, -1).astype(jnp.float32), cp)

    g1, b1 = vec(p["bn1_g"], cin_p), vec(p["bn1_b"], cin_p)
    g2, b2 = vec(p["bn2_g"], c1_p), vec(p["bn2_b"], c1_p)
    g3, b3 = vec(p["bn3_g"], c1_p), vec(p["bn3_b"], c1_p)
    gs, bs = vec(p["bns_g"], cin_p), vec(p["bns_b"], cin_p)

    w1 = _pad2d(p["conv1_w"].reshape(cout1, cin).T.astype(jnp.float32),
                cin_p, c1_p)
    w2_taps = jnp.stack(
        [_pad2d(p["conv2_w"][:, :, i, j].T.astype(jnp.float32), c1_p, c1_p)
         for i in range(3) for j in range(3)], axis=0)
    w3 = _pad2d(p["conv3_w"].reshape(cexp, cout1).T.astype(jnp.float32),
                c1_p, cexp_p)
    ws = _pad2d(p["convs_w"].reshape(cexp, cin).T.astype(jnp.float32),
                cin_p, cexp_p)

    bias1 = vec(p["conv1_b"], c1_p)
    bias2 = vec(p["conv2_b"], c1_p)
    bias3 = vec(p["conv3_b"], cexp_p)
    biass = vec(p["convs_b"], cexp_p)

    # bn1 and the shortcut BN normalize the same x -> single stats pass over x.
    sx, ssx = bn_channel_sums(x4.reshape(n * h * w, cin_p))
    count_x = float(n * h * w)
    scale1, shift1 = _scale_shift(sx, ssx, g1, b1, count_x)
    scales, shifts = _scale_shift(sx, ssx, gs, bs, count_x)

    # strided view of x, shared by conv1 and the shortcut conv
    xs = x4[:, ::stride, ::stride, :]

    # main branch: BN+ReLU fused into every conv; output BN stats fused into
    # the producing conv's epilogue (no separate stats passes over y1/y2)
    y1, s1, ss1 = fused_bn_conv1x1(xs, scale1, shift1, w1, bias1,
                                   compute_stats=True)
    n1, h1, w1s, _ = y1.shape
    scale2, shift2 = _scale_shift(s1, ss1, g2, b2, float(n1 * h1 * w1s))

    y2, s2, ss2 = fused_bn_conv3x3(y1, scale2, shift2, w2_taps, bias2, stride)
    n2, h2, w2s, _ = y2.shape
    scale3, shift3 = _scale_shift(s2, ss2, g3, b3, float(n2 * h2 * w2s))

    y3 = fused_bn_conv1x1(y2[:, ::stride, ::stride, :], scale3, shift3,
                          w3, bias3, compute_stats=False)

    # shortcut branch: BN(bns)+ReLU+conv1x1 with residual add fused in epilogue
    res = fused_shortcut_conv_add(xs, scales, shifts, ws, biass, y3)

    res = res[..., :cexp]                       # drop lane padding
    return jnp.transpose(res, (0, 3, 1, 2))     # back to NCHW


# ---------------------------------------------------------------------------
# Pure-JAX reference (for correctness check)
# ---------------------------------------------------------------------------
def reference_forward(x_nchw, p, stride):
    x = jnp.transpose(x_nchw, (0, 2, 3, 1)).astype(jnp.float32)

    def bn_relu_ref(x, g, b):
        mean = jnp.mean(x, axis=(0, 1, 2), keepdims=True)
        var = jnp.mean((x - mean) ** 2, axis=(0, 1, 2), keepdims=True)
        y = (x - mean) / jnp.sqrt(var + EPS) * g.reshape(1, 1, 1, -1) \
            + b.reshape(1, 1, 1, -1)
        return jnp.maximum(y, 0.0)

    def conv_ref(x, w_oihw, b, s):
        w = jnp.transpose(w_oihw, (2, 3, 1, 0))  # HWIO
        y = jax.lax.conv_general_dilated(
            x, w, (s, s), "VALID",
            dimension_numbers=("NHWC", "HWIO", "NHWC"),
            precision=jax.lax.Precision.HIGHEST)
        return y + b.reshape(1, 1, 1, -1)

    out = bn_relu_ref(x, p["bn1_g"], p["bn1_b"])
    out = conv_ref(out, p["conv1_w"], p["conv1_b"], stride)
    out = bn_relu_ref(out, p["bn2_g"], p["bn2_b"])
    out = conv_ref(out, p["conv2_w"], p["conv2_b"], stride)
    out = bn_relu_ref(out, p["bn3_g"], p["bn3_b"])
    out = conv_ref(out, p["conv3_w"], p["conv3_b"], stride)
    sc = bn_relu_ref(x, p["bns_g"], p["bns_b"])
    sc = conv_ref(sc, p["convs_w"], p["convs_b"], stride)
    return jnp.transpose(out + sc, (0, 3, 1, 2))


# ---------------------------------------------------------------------------
# Deterministic synthetic parameters
# ---------------------------------------------------------------------------
def make_params(key, in_channels, out_channels):
    exp = out_channels * 4
    ks = jax.random.split(key, 16)

    def w(k, shape, s=0.1):
        return (s * jax.random.normal(k, shape)).astype(jnp.float32)

    return {
        "bn1_g": 1.0 + w(ks[0], (in_channels,)),  "bn1_b": w(ks[1], (in_channels,)),
        "conv1_w": w(ks[2], (out_channels, in_channels, 1, 1)),
        "conv1_b": w(ks[3], (out_channels,), 0.05),
        "bn2_g": 1.0 + w(ks[4], (out_channels,)), "bn2_b": w(ks[5], (out_channels,)),
        "conv2_w": w(ks[6], (out_channels, out_channels, 3, 3)),
        "conv2_b": w(ks[7], (out_channels,), 0.05),
        "bn3_g": 1.0 + w(ks[8], (out_channels,)), "bn3_b": w(ks[9], (out_channels,)),
        "conv3_w": w(ks[10], (exp, out_channels, 1, 1)),
        "conv3_b": w(ks[11], (exp,), 0.05),
        "bns_g": 1.0 + w(ks[12], (exp,)),         "bns_b": w(ks[13], (exp,)),
        "convs_w": w(ks[14], (exp, in_channels, 1, 1)),
        "convs_b": w(ks[15], (exp,), 0.05),
    }


if __name__ == "__main__":
    key = jax.random.PRNGKey(0)
    kx, kp = jax.random.split(key)

    # in_channels must equal out_channels*4 so the shortcut BatchNorm accepts x.
    in_channels, out_channels, stride = 16, 4, 2
    x = jax.random.normal(kx, (2, in_channels, 12, 12), dtype=jnp.float32)
    params = make_params(kp, in_channels, out_channels)

    fwd = jax.jit(lambda xx, pp: preact_bottleneck_forward(xx, pp, stride))
    out = jax.block_until_ready(fwd(x, params))

    ref = jax.block_until_ready(reference_forward(x, params, stride))
    assert out.shape == ref.shape == (2, out_channels * 4, 6, 6), (out.shape, ref.shape)
    max_err = float(jnp.max(jnp.abs(out - ref)))
    assert max_err < 1e-2, f"Pallas/JAX mismatch: max abs err = {max_err}"

    print("KERNEL_OK")
</pallas_src>

<mosaic_0001>
module attributes {stable_mosaic.version = 11 : i64} {
  func.func @_bn_stats_kernel(%arg0: i32, %arg1: memref<288x128xf32, #tpu.memory_space<vmem>>, %arg2: memref<1x128xf32, #tpu.memory_space<vmem>>, %arg3: memref<1x128xf32, #tpu.memory_space<vmem>>) attributes {dimension_semantics = [#tpu.dimension_semantics<arbitrary>], iteration_bounds = array<i64: 1>, scalar_prefetch = 0 : i64, scratch_operands = 0 : i64, tpu.core_type = #tpu.core_type<tc>, window_params = [{transform_indices = @transform_0, window_bounds = array<i64: 288, 128>}, {pipeline_mode = #tpu.pipeline_mode<synchronous>, transform_indices = @transform_1, window_bounds = array<i64: 1, 128>}, {pipeline_mode = #tpu.pipeline_mode<synchronous>, transform_indices = @transform_2, window_bounds = array<i64: 1, 128>}]} {
    %c0 = arith.constant 0 : index
    %c0_0 = arith.constant 0 : index
    %0 = vector.load %arg1[%c0, %c0_0] : memref<288x128xf32, #tpu.memory_space<vmem>>, vector<288x128xf32>
    %cst = arith.constant dense<0.000000e+00> : vector<128xf32>
    %1 = vector.multi_reduction <add>, %0, %cst [0] : vector<288x128xf32> to vector<128xf32>
    %2 = vector.shape_cast %1 : vector<128xf32> to vector<1x128xf32>
    %3 = arith.mulf %0, %0 : vector<288x128xf32>
    %cst_1 = arith.constant dense<0.000000e+00> : vector<128xf32>
    %4 = vector.multi_reduction <add>, %3, %cst_1 [0] : vector<288x128xf32> to vector<128xf32>
    %5 = vector.shape_cast %4 : vector<128xf32> to vector<1x128xf32>
    %c0_i32 = arith.constant 0 : i32
    %6 = arith.cmpi eq, %arg0, %c0_i32 : i32
    %7 = arith.extui %6 : i1 to i32
    %c0_i32_2 = arith.constant 0 : i32
    %8 = arith.cmpi ne, %7, %c0_i32_2 : i32
    scf.if %8 {
      %c0_5 = arith.constant 0 : index
      %c0_6 = arith.constant 0 : index
      %12 = vector.load %arg2[%c0_5, %c0_6] : memref<1x128xf32, #tpu.memory_space<vmem>>, vector<1x128xf32>
      tpu.vector_store %arg2[%c0_5, %c0_6], %2 {strides = array<i32>} : memref<1x128xf32, #tpu.memory_space<vmem>>, vector<1x128xf32>,
      %c0_7 = arith.constant 0 : index
      %c0_8 = arith.constant 0 : index
      %13 = vector.load %arg3[%c0_7, %c0_8] : memref<1x128xf32, #tpu.memory_space<vmem>>, vector<1x128xf32>
      tpu.vector_store %arg3[%c0_7, %c0_8], %5 {strides = array<i32>} : memref<1x128xf32, #tpu.memory_space<vmem>>, vector<1x128xf32>,
    } else {
    }
    %c0_i32_3 = arith.constant 0 : i32
    %9 = arith.cmpi ne, %arg0, %c0_i32_3 : i32
    %10 = arith.extui %9 : i1 to i32
    %c0_i32_4 = arith.constant 0 : i32
    %11 = arith.cmpi ne, %10, %c0_i32_4 : i32
    scf.if %11 {
      %c0_5 = arith.constant 0 : index
      %c0_6 = arith.constant 0 : index
      %12 = vector.load %arg2[%c0_5, %c0_6] : memref<1x128xf32, #tpu.memory_space<vmem>>, vector<1x128xf32>
      %13 = arith.addf %12, %2 : vector<1x128xf32>
      %c0_7 = arith.constant 0 : index
      %c0_8 = arith.constant 0 : index
      %14 = vector.load %arg2[%c0_7, %c0_8] : memref<1x128xf32, #tpu.memory_space<vmem>>, vector<1x128xf32>
      tpu.vector_store %arg2[%c0_7, %c0_8], %13 {strides = array<i32>} : memref<1x128xf32, #tpu.memory_space<vmem>>, vector<1x128xf32>,
      %c0_9 = arith.constant 0 : index
      %c0_10 = arith.constant 0 : index
      %15 = vector.load %arg3[%c0_9, %c0_10] : memref<1x128xf32, #tpu.memory_space<vmem>>, vector<1x128xf32>
      %16 = arith.addf %15, %5 : vector<1x128xf32>
      %c0_11 = arith.constant 0 : index
      %c0_12 = arith.constant 0 : index
      %17 = vector.load %arg3[%c0_11, %c0_12] : memref<1x128xf32, #tpu.memory_space<vmem>>, vector<1x128xf32>
      tpu.vector_store %arg3[%c0_11, %c0_12], %16 {strides = array<i32>} : memref<1x128xf32, #tpu.memory_space<vmem>>, vector<1x128xf32>,
    } else {
    }
    return
  }
  func.func @transform_0(%arg0: i32) -> (i32, i32) {
    %c0_i32 = arith.constant 0 : i32
    %c0_i32_0 = arith.constant 0 : i32
    return %arg0, %c0_i32 : i32, i32
  }
  func.func @transform_1(%arg0: i32) -> (i32, i32) {
    %c0_i32 = arith.constant 0 : i32
    %c0_i32_0 = arith.constant 0 : i32
    %c0_i32_1 = arith.constant 0 : i32
    return %c0_i32, %c0_i32_0 : i32, i32
  }
  func.func @transform_2(%arg0: i32) -> (i32, i32) {
    %c0_i32 = arith.constant 0 : i32
    %c0_i32_0 = arith.constant 0 : i32
    %c0_i32_1 = arith.constant 0 : i32
    return %c0_i32, %c0_i32_0 : i32, i32
  }
}

module attributes {stable_mosaic.version = 11 : i64} {
  func.func @kernel(%arg0: i32, %arg1: memref<72x128xf32, #tpu.memory_space<vmem>>, %arg2: memref<1x128xf32, #tpu.memory_space<vmem>>, %arg3: memref<1x128xf32, #tpu.memory_space<vmem>>, %arg4: memref<128x128xf32, #tpu.memory_space<vmem>>, %arg5: memref<1x128xf32, #tpu.memory_space<vmem>>, %arg6: memref<72x128xf32, #tpu.memory_space<vmem>>, %arg7: memref<1x128xf32, #tpu.memory_space<vmem>>, %arg8: memref<1x128xf32, #tpu.memory_space<vmem>>) attributes {dimension_semantics = [#tpu.dimension_semantics<arbitrary>], iteration_bounds = array<i64: 1>, scalar_prefetch = 0 : i64, scratch_operands = 0 : i64, tpu.core_type = #tpu.core_type<tc>, window_params = [{transform_indices = @transform_0, window_bounds = array<i64: 72, 128>}, {pipeline_mode = #tpu.pipeline_mode<synchronous>, transform_indices = @transform_1, window_bounds = array<i64: 1, 128>}, {pipeline_mode = #tpu.pipeline_mode<synchronous>, transform_indices = @transform_2, window_bounds = array<i64: 1, 128>}, {pipeline_mode = #tpu.pipeline_mode<synchronous>, transform_indices = @transform_3, window_bounds = array<i64: 128, 128>}, {pipeline_mode = #tpu.pipeline_mode<synchronous>, transform_indices = @transform_4, window_bounds = array<i64: 1, 128>}, {transform_indices = @transform_5, window_bounds = array<i64: 72, 128>}, {pipeline_mode = #tpu.pipeline_mode<synchronous>, transform_indices = @transform_6, window_bounds = array<i64: 1, 128>}, {pipeline_mode = #tpu.pipeline_mode<synchronous>, transform_indices = @transform_7, window_bounds = array<i64: 1, 128>}]} {
    %c0 = arith.constant 0 : index
    %c0_0 = arith.constant 0 : index
    %0 = vector.load %arg1[%c0, %c0_0] : memref<72x128xf32, #tpu.memory_space<vmem>>, vector<72x128xf32>
    %c0_1 = arith.constant 0 : index
    %c0_2 = arith.constant 0 : index
    %1 = vector.load %arg2[%c0_1, %c0_2] : memref<1x128xf32, #tpu.memory_space<vmem>>, vector<1x128xf32>
    %2 = vector.broadcast %1 : vector<1x128xf32> to vector<72x128xf32>
    %3 = arith.mulf %0, %2 : vector<72x128xf32>
    %c0_3 = arith.constant 0 : index
    %c0_4 = arith.constant 0 : index
    %4 = vector.load %arg3[%c0_3, %c0_4] : memref<1x128xf32, #tpu.memory_space<vmem>>, vector<1x128xf32>
    %5 = vector.broadcast %4 : vector<1x128xf32> to vector<72x128xf32>
    %6 = arith.addf %3, %5 : vector<72x128xf32>
    %cst = arith.constant 0.000000e+00 : f32
    %7 = vector.broadcast %cst : f32 to vector<72x128xf32>
    %8 = arith.maximumf %6, %7 : vector<72x128xf32>
    %c0_5 = arith.constant 0 : index
    %c0_6 = arith.constant 0 : index
    %9 = vector.load %arg4[%c0_5, %c0_6] : memref<128x128xf32, #tpu.memory_space<vmem>>, vector<128x128xf32>
    %cst_7 = arith.constant dense<0.000000e+00> : vector<72x128xf32>
    %10 = tpu.matmul %8, %9, %cst_7 {dimension_numbers = #tpu.dot_dimension_numbers<[1], [0], [0], [1], [0, 0, 1, 1], [], []>} : vector<72x128xf32>, vector<128x128xf32>, vector<72x128xf32> -> vector<72x128xf32>
    %c0_8 = arith.constant 0 : index
    %c0_9 = arith.constant 0 : index
    %11 = vector.load %arg5[%c0_8, %c0_9] : memref<1x128xf32, #tpu.memory_space<vmem>>, vector<1x128xf32>
    %12 = vector.broadcast %11 : vector<1x128xf32> to vector<72x128xf32>
    %13 = arith.addf %10, %12 : vector<72x128xf32>
    %c0_10 = arith.constant 0 : index
    %c0_11 = arith.constant 0 : index
    %14 = vector.load %arg6[%c0_10, %c0_11] : memref<72x128xf32, #tpu.memory_space<vmem>>, vector<72x128xf32>
    tpu.vector_store %arg6[%c0_10, %c0_11], %13 {strides = array<i32>} : memref<72x128xf32, #tpu.memory_space<vmem>>, vector<72x128xf32>,
    %c72_i32 = arith.constant 72 : i32
    %15 = arith.muli %arg0, %c72_i32 : i32
    %16 = tpu.iota {dimensions = array<i32: 0>} : vector<72x1xi32>
    %17 = vector.broadcast %15 : i32 to vector<72x1xi32>
    %18 = arith.addi %17, %16 : vector<72x1xi32>
    %c72_i32_12 = arith.constant 72 : i32
    %19 = vector.broadcast %c72_i32_12 : i32 to vector<72x1xi32>
    %20 = arith.cmpi slt, %18, %19 : vector<72x1xi32>
    %cst_13 = arith.constant 0.000000e+00 : f32
    %21 = vector.shape_cast %20 : vector<72x1xi1> to vector<72x1xi1>
    %22 = vector.broadcast %21 : vector<72x1xi1> to vector<72x128xi1>
    %23 = vector.broadcast %cst_13 : f32 to vector<72x128xf32>
    %24 = arith.select %22, %13, %23 : vector<72x128xi1>, vector<72x128xf32>
    %cst_14 = arith.constant dense<0.000000e+00> : vector<128xf32>
    %25 = vector.multi_reduction <add>, %24, %cst_14 [0] : vector<72x128xf32> to vector<128xf32>
    %26 = vector.shape_cast %25 : vector<128xf32> to vector<1x128xf32>
    %27 = arith.mulf %24, %24 : vector<72x128xf32>
    %cst_15 = arith.constant dense<0.000000e+00> : vector<128xf32>
    %28 = vector.multi_reduction <add>, %27, %cst_15 [0] : vector<72x128xf32> to vector<128xf32>
    %29 = vector.shape_cast %28 : vector<128xf32> to vector<1x128xf32>
    %c0_i32 = arith.constant 0 : i32
    %30 = arith.cmpi eq, %arg0, %c0_i32 : i32
    %31 = arith.extui %30 : i1 to i32
    %c0_i32_16 = arith.constant 0 : i32
    %32 = arith.cmpi ne, %31, %c0_i32_16 : i32
    scf.if %32 {
      %c0_19 = arith.constant 0 : index
      %c0_20 = arith.constant 0 : index
      %36 = vector.load %arg7[%c0_19, %c0_20] : memref<1x128xf32, #tpu.memory_space<vmem>>, vector<1x128xf32>
      tpu.vector_store %arg7[%c0_19, %c0_20], %26 {strides = array<i32>} : memref<1x128xf32, #tpu.memory_space<vmem>>, vector<1x128xf32>,
      %c0_21 = arith.constant 0 : index
      %c0_22 = arith.constant 0 : index
      %37 = vector.load %arg8[%c0_21, %c0_22] : memref<1x128xf32, #tpu.memory_space<vmem>>, vector<1x128xf32>
      tpu.vector_store %arg8[%c0_21, %c0_22], %29 {strides = array<i32>} : memref<1x128xf32, #tpu.memory_space<vmem>>, vector<1x128xf32>,
    } else {
    }
    %c0_i32_17 = arith.constant 0 : i32
    %33 = arith.cmpi ne, %arg0, %c0_i32_17 : i32
    %34 = arith.extui %33 : i1 to i32
    %c0_i32_18 = arith.constant 0 : i32
    %35 = arith.cmpi ne, %34, %c0_i32_18 : i32
    scf.if %35 {
      %c0_19 = arith.constant 0 : index
      %c0_20 = arith.constant 0 : index
      %36 = vector.load %arg7[%c0_19, %c0_20] : memref<1x128xf32, #tpu.memory_space<vmem>>, vector<1x128xf32>
      %37 = arith.addf %36, %26 : vector<1x128xf32>
      %c0_21 = arith.constant 0 : index
      %c0_22 = arith.constant 0 : index
      %38 = vector.load %arg7[%c0_21, %c0_22] : memref<1x128xf32, #tpu.memory_space<vmem>>, vector<1x128xf32>
      tpu.vector_store %arg7[%c0_21, %c0_22], %37 {strides = array<i32>} : memref<1x128xf32, #tpu.memory_space<vmem>>, vector<1x128xf32>,
      %c0_23 = arith.constant 0 : index
      %c0_24 = arith.constant 0 : index
      %39 = vector.load %arg8[%c0_23, %c0_24] : memref<1x128xf32, #tpu.memory_space<vmem>>, vector<1x128xf32>
      %40 = arith.addf %39, %29 : vector<1x128xf32>
      %c0_25 = arith.constant 0 : index
      %c0_26 = arith.constant 0 : index
      %41 = vector.load %arg8[%c0_25, %c0_26] : memref<1x128xf32, #tpu.memory_space<vmem>>, vector<1x128xf32>
      tpu.vector_store %arg8[%c0_25, %c0_26], %40 {strides = array<i32>} : memref<1x128xf32, #tpu.memory_space<vmem>>, vector<1x128xf32>,
    } else {
    }
    return
  }
  func.func @transform_0(%arg0: i32) -> (i32, i32) {
    %c0_i32 = arith.constant 0 : i32
    %c0_i32_0 = arith.constant 0 : i32
    return %arg0, %c0_i32 : i32, i32
  }
  func.func @transform_1(%arg0: i32) -> (i32, i32) {
    %c0_i32 = arith.constant 0 : i32
    %c0_i32_0 = arith.constant 0 : i32
    %c0_i32_1 = arith.constant 0 : i32
    return %c0_i32, %c0_i32_0 : i32, i32
  }
  func.func @transform_2(%arg0: i32) -> (i32, i32) {
    %c0_i32 = arith.constant 0 : i32
    %c0_i32_0 = arith.constant 0 : i32
    %c0_i32_1 = arith.constant 0 : i32
    return %c0_i32, %c0_i32_0 : i32, i32
  }
  func.func @transform_3(%arg0: i32) -> (i32, i32) {
    %c0_i32 = arith.constant 0 : i32
    %c0_i32_0 = arith.constant 0 : i32
    %c0_i32_1 = arith.constant 0 : i32
    return %c0_i32, %c0_i32_0 : i32, i32
  }
  func.func @transform_4(%arg0: i32) -> (i32, i32) {
    %c0_i32 = arith.constant 0 : i32
    %c0_i32_0 = arith.constant 0 : i32
    %c0_i32_1 = arith.constant 0 : i32
    return %c0_i32, %c0_i32_0 : i32, i32
  }
  func.func @transform_5(%arg0: i32) -> (i32, i32) {
    %c0_i32 = arith.constant 0 : i32
    %c0_i32_0 = arith.constant 0 : i32
    return %arg0, %c0_i32 : i32, i32
  }
  func.func @transform_6(%arg0: i32) -> (i32, i32) {
    %c0_i32 = arith.constant 0 : i32
    %c0_i32_0 = arith.constant 0 : i32
    %c0_i32_1 = arith.constant 0 : i32
    return %c0_i32, %c0_i32_0 : i32, i32
  }
  func.func @transform_7(%arg0: i32) -> (i32, i32) {
    %c0_i32 = arith.constant 0 : i32
    %c0_i32_0 = arith.constant 0 : i32
    %c0_i32_1 = arith.constant 0 : i32
    return %c0_i32, %c0_i32_0 : i32, i32
  }
}

module attributes {stable_mosaic.version = 11 : i64} {
  func.func @kernel(%arg0: i32, %arg1: memref<8x128xf32, #tpu.memory_space<vmem>>, %arg2: memref<1x128xf32, #tpu.memory_space<vmem>>, %arg3: memref<1x128xf32, #tpu.memory_space<vmem>>, %arg4: memref<128x128xf32, #tpu.memory_space<vmem>>, %arg5: memref<1x128xf32, #tpu.memory_space<vmem>>, %arg6: memref<8x128xf32, #tpu.memory_space<vmem>>) attributes {dimension_semantics = [#tpu.dimension_semantics<parallel>], iteration_bounds = array<i64: 1>, scalar_prefetch = 0 : i64, scratch_operands = 0 : i64, tpu.core_type = #tpu.core_type<tc>, window_params = [{transform_indices = @transform_0, window_bounds = array<i64: 8, 128>}, {pipeline_mode = #tpu.pipeline_mode<synchronous>, transform_indices = @transform_1, window_bounds = array<i64: 1, 128>}, {pipeline_mode = #tpu.pipeline_mode<synchronous>, transform_indices = @transform_2, window_bounds = array<i64: 1, 128>}, {pipeline_mode = #tpu.pipeline_mode<synchronous>, transform_indices = @transform_3, window_bounds = array<i64: 128, 128>}, {pipeline_mode = #tpu.pipeline_mode<synchronous>, transform_indices = @transform_4, window_bounds = array<i64: 1, 128>}, {transform_indices = @transform_5, window_bounds = array<i64: 8, 128>}]} {
    %c0 = arith.constant 0 : index
    %c0_0 = arith.constant 0 : index
    %0 = vector.load %arg1[%c0, %c0_0] : memref<8x128xf32, #tpu.memory_space<vmem>>, vector<8x128xf32>
    %c0_1 = arith.constant 0 : index
    %c0_2 = arith.constant 0 : index
    %1 = vector.load %arg2[%c0_1, %c0_2] : memref<1x128xf32, #tpu.memory_space<vmem>>, vector<1x128xf32>
    %2 = vector.broadcast %1 : vector<1x128xf32> to vector<8x128xf32>
    %3 = arith.mulf %0, %2 : vector<8x128xf32>
    %c0_3 = arith.constant 0 : index
    %c0_4 = arith.constant 0 : index
    %4 = vector.load %arg3[%c0_3, %c0_4] : memref<1x128xf32, #tpu.memory_space<vmem>>, vector<1x128xf32>
    %5 = vector.broadcast %4 : vector<1x128xf32> to vector<8x128xf32>
    %6 = arith.addf %3, %5 : vector<8x128xf32>
    %cst = arith.constant 0.000000e+00 : f32
    %7 = vector.broadcast %cst : f32 to vector<8x128xf32>
    %8 = arith.maximumf %6, %7 : vector<8x128xf32>
    %c0_5 = arith.constant 0 : index
    %c0_6 = arith.constant 0 : index
    %9 = vector.load %arg4[%c0_5, %c0_6] : memref<128x128xf32, #tpu.memory_space<vmem>>, vector<128x128xf32>
    %cst_7 = arith.constant dense<0.000000e+00> : vector<8x128xf32>
    %10 = tpu.matmul %8, %9, %cst_7 {dimension_numbers = #tpu.dot_dimension_numbers<[1], [0], [0], [1], [0, 0, 1, 1], [], []>} : vector<8x128xf32>, vector<128x128xf32>, vector<8x128xf32> -> vector<8x128xf32>
    %c0_8 = arith.constant 0 : index
    %c0_9 = arith.constant 0 : index
    %11 = vector.load %arg5[%c0_8, %c0_9] : memref<1x128xf32, #tpu.memory_space<vmem>>, vector<1x128xf32>
    %12 = vector.broadcast %11 : vector<1x128xf32> to vector<8x128xf32>
    %13 = arith.addf %10, %12 : vector<8x128xf32>
    %c0_10 = arith.constant 0 : index
    %c0_11 = arith.constant 0 : index
    %14 = vector.load %arg6[%c0_10, %c0_11] : memref<8x128xf32, #tpu.memory_space<vmem>>, vector<8x128xf32>
    tpu.vector_store %arg6[%c0_10, %c0_11], %13 {strides = array<i32>} : memref<8x128xf32, #tpu.memory_space<vmem>>, vector<8x128xf32>,
    return
  }
  func.func @transform_0(%arg0: i32) -> (i32, i32) {
    %c0_i32 = arith.constant 0 : i32
    %c0_i32_0 = arith.constant 0 : i32
    return %arg0, %c0_i32 : i32, i32
  }
  func.func @transform_1(%arg0: i32) -> (i32, i32) {
    %c0_i32 = arith.constant 0 : i32
    %c0_i32_0 = arith.constant 0 : i32
    %c0_i32_1 = arith.constant 0 : i32
    return %c0_i32, %c0_i32_0 : i32, i32
  }
  func.func @transform_2(%arg0: i32) -> (i32, i32) {
    %c0_i32 = arith.constant 0 : i32
    %c0_i32_0 = arith.constant 0 : i32
    %c0_i32_1 = arith.constant 0 : i32
    return %c0_i32, %c0_i32_0 : i32, i32
  }
  func.func @transform_3(%arg0: i32) -> (i32, i32) {
    %c0_i32 = arith.constant 0 : i32
    %c0_i32_0 = arith.constant 0 : i32
    %c0_i32_1 = arith.constant 0 : i32
    return %c0_i32, %c0_i32_0 : i32, i32
  }
  func.func @transform_4(%arg0: i32) -> (i32, i32) {
    %c0_i32 = arith.constant 0 : i32
    %c0_i32_0 = arith.constant 0 : i32
    %c0_i32_1 = arith.constant 0 : i32
    return %c0_i32, %c0_i32_0 : i32, i32
  }
  func.func @transform_5(%arg0: i32) -> (i32, i32) {
    %c0_i32 = arith.constant 0 : i32
    %c0_i32_0 = arith.constant 0 : i32
    return %arg0, %c0_i32 : i32, i32
  }
}

module attributes {stable_mosaic.version = 11 : i64} {
  func.func @kernel(%arg0: i32, %arg1: i32, %arg2: memref<1x8x128xf32, #tpu.memory_space<vmem>>, %arg3: memref<1x128xf32, #tpu.memory_space<vmem>>, %arg4: memref<1x128xf32, #tpu.memory_space<vmem>>, %arg5: memref<1x128x128xf32, #tpu.memory_space<vmem>>, %arg6: memref<1x128xf32, #tpu.memory_space<vmem>>, %arg7: memref<8x128xf32, #tpu.memory_space<vmem>>, %arg8: memref<1x128xf32, #tpu.memory_space<vmem>>, %arg9: memref<1x128xf32, #tpu.memory_space<vmem>>, %arg10: memref<8x128xf32, #tpu.memory_space<vmem>>) attributes {dimension_semantics = [#tpu.dimension_semantics<arbitrary>, #tpu.dimension_semantics<arbitrary>], iteration_bounds = array<i64: 1, 9>, scalar_prefetch = 0 : i64, scratch_operands = 1 : i64, tpu.core_type = #tpu.core_type<tc>, window_params = [{transform_indices = @transform_0, window_bounds = array<i64: 1, 8, 128>}, {pipeline_mode = #tpu.pipeline_mode<synchronous>, transform_indices = @transform_1, window_bounds = array<i64: 1, 128>}, {pipeline_mode = #tpu.pipeline_mode<synchronous>, transform_indices = @transform_2, window_bounds = array<i64: 1, 128>}, {transform_indices = @transform_3, window_bounds = array<i64: 1, 128, 128>}, {pipeline_mode = #tpu.pipeline_mode<synchronous>, transform_indices = @transform_4, window_bounds = array<i64: 1, 128>}, {transform_indices = @transform_5, window_bounds = array<i64: 8, 128>}, {pipeline_mode = #tpu.pipeline_mode<synchronous>, transform_indices = @transform_6, window_bounds = array<i64: 1, 128>}, {pipeline_mode = #tpu.pipeline_mode<synchronous>, transform_indices = @transform_7, window_bounds = array<i64: 1, 128>}]} {
    %c0 = arith.constant 0 : index
    %c0_0 = arith.constant 0 : index
    %c0_1 = arith.constant 0 : index
    %0 = vector.load %arg2[%c0, %c0_0, %c0_1] : memref<1x8x128xf32, #tpu.memory_space<vmem>>, vector<1x8x128xf32>
    %1 = vector.shape_cast %0 : vector<1x8x128xf32> to vector<8x128xf32>
    %c0_2 = arith.constant 0 : index
    %c0_3 = arith.constant 0 : index
    %2 = vector.load %arg3[%c0_2, %c0_3] : memref<1x128xf32, #tpu.memory_space<vmem>>, vector<1x128xf32>
    %3 = vector.broadcast %2 : vector<1x128xf32> to vector<8x128xf32>
    %4 = arith.mulf %1, %3 : vector<8x128xf32>
    %c0_4 = arith.constant 0 : index
    %c0_5 = arith.constant 0 : index
    %5 = vector.load %arg4[%c0_4, %c0_5] : memref<1x128xf32, #tpu.memory_space<vmem>>, vector<1x128xf32>
    %6 = vector.broadcast %5 : vector<1x128xf32> to vector<8x128xf32>
    %7 = arith.addf %4, %6 : vector<8x128xf32>
    %cst = arith.constant 0.000000e+00 : f32
    %8 = vector.broadcast %cst : f32 to vector<8x128xf32>
    %9 = arith.maximumf %7, %8 : vector<8x128xf32>
    %c0_i32 = arith.constant 0 : i32
    %10 = arith.cmpi eq, %arg0, %c0_i32 : i32
    %c0_i32_6 = arith.constant 0 : i32
    %11 = arith.cmpi eq, %arg1, %c0_i32_6 : i32
    %12 = arith.andi %10, %11 : i1
    %13 = arith.extui %12 : i1 to i32
    %c0_i32_7 = arith.constant 0 : i32
    %14 = arith.cmpi ne, %13, %c0_i32_7 : i32
    scf.if %14 {
      %cst_19 = arith.constant 0.000000e+00 : f32
      %27 = vector.broadcast %cst_19 : f32 to vector<1x128xf32>
      %c0_20 = arith.constant 0 : index
      %c0_21 = arith.constant 0 : index
      %28 = vector.load %arg8[%c0_20, %c0_21] : memref<1x128xf32, #tpu.memory_space<vmem>>, vector<1x128xf32>
      tpu.vector_store %arg8[%c0_20, %c0_21], %27 {strides = array<i32>} : memref<1x128xf32, #tpu.memory_space<vmem>>, vector<1x128xf32>,
      %cst_22 = arith.constant 0.000000e+00 : f32
      %29 = vector.broadcast %cst_22 : f32 to vector<1x128xf32>
      %c0_23 = arith.constant 0 : index
      %c0_24 = arith.constant 0 : index
      %30 = vector.load %arg9[%c0_23, %c0_24] : memref<1x128xf32, #tpu.memory_space<vmem>>, vector<1x128xf32>
      tpu.vector_store %arg9[%c0_23, %c0_24], %29 {strides = array<i32>} : memref<1x128xf32, #tpu.memory_space<vmem>>, vector<1x128xf32>,
    } else {
    }
    %c0_i32_8 = arith.constant 0 : i32
    %15 = arith.cmpi eq, %arg1, %c0_i32_8 : i32
    %16 = arith.extui %15 : i1 to i32
    %c0_i32_9 = arith.constant 0 : i32
    %17 = arith.cmpi ne, %16, %c0_i32_9 : i32
    scf.if %17 {
      %cst_19 = arith.constant 0.000000e+00 : f32
      %27 = vector.broadcast %cst_19 : f32 to vector<8x128xf32>
      %c0_20 = arith.constant 0 : index
      %c0_21 = arith.constant 0 : index
      %28 = vector.load %arg10[%c0_20, %c0_21] : memref<8x128xf32, #tpu.memory_space<vmem>>, vector<8x128xf32>
      tpu.vector_store %arg10[%c0_20, %c0_21], %27 {strides = array<i32>} : memref<8x128xf32, #tpu.memory_space<vmem>>, vector<8x128xf32>,
    } else {
    }
    %c0_10 = arith.constant 0 : index
    %c0_11 = arith.constant 0 : index
    %18 = vector.load %arg10[%c0_10, %c0_11] : memref<8x128xf32, #tpu.memory_space<vmem>>, vector<8x128xf32>
    %c0_12 = arith.constant 0 : index
    %c0_13 = arith.constant 0 : index
    %c0_14 = arith.constant 0 : index
    %19 = vector.load %arg5[%c0_12, %c0_13, %c0_14] : memref<1x128x128xf32, #tpu.memory_space<vmem>>, vector<1x128x128xf32>
    %20 = vector.shape_cast %19 : vector<1x128x128xf32> to vector<128x128xf32>
    %cst_15 = arith.constant dense<0.000000e+00> : vector<8x128xf32>
    %21 = tpu.matmul %9, %20, %cst_15 {dimension_numbers = #tpu.dot_dimension_numbers<[1], [0], [0], [1], [0, 0, 1, 1], [], []>} : vector<8x128xf32>, vector<128x128xf32>, vector<8x128xf32> -> vector<8x128xf32>
    %22 = arith.addf %18, %21 : vector<8x128xf32>
    %c0_16 = arith.constant 0 : index
    %c0_17 = arith.constant 0 : index
    %23 = vector.load %arg10[%c0_16, %c0_17] : memref<8x128xf32, #tpu.memory_space<vmem>>, vector<8x128xf32>
    tpu.vector_store %arg10[%c0_16, %c0_17], %22 {strides = array<i32>} : memref<8x128xf32, #tpu.memory_space<vmem>>, vector<8x128xf32>,
    %c8_i32 = arith.constant 8 : i32
    %24 = arith.cmpi eq, %arg1, %c8_i32 : i32
    %25 = arith.extui %24 : i1 to i32
    %c0_i32_18 = arith.constant 0 : i32
    %26 = arith.cmpi ne, %25, %c0_i32_18 : i32
    scf.if %26 {
      %c0_19 = arith.constant 0 : index
      %c0_20 = arith.constant 0 : index
      %27 = vector.load %arg10[%c0_19, %c0_20] : memref<8x128xf32, #tpu.memory_space<vmem>>, vector<8x128xf32>
      %c0_21 = arith.constant 0 : index
      %c0_22 = arith.constant 0 : index
      %28 = vector.load %arg6[%c0_21, %c0_22] : memref<1x128xf32, #tpu.memory_space<vmem>>, vector<1x128xf32>
      %29 = vector.broadcast %28 : vector<1x128xf32> to vector<8x128xf32>
      %30 = arith.addf %27, %29 : vector<8x128xf32>
      %c0_23 = arith.constant 0 : index
      %c0_24 = arith.constant 0 : index
      %31 = vector.load %arg7[%c0_23, %c0_24] : memref<8x128xf32, #tpu.memory_space<vmem>>, vector<8x128xf32>
      tpu.vector_store %arg7[%c0_23, %c0_24], %30 {strides = array<i32>} : memref<8x128xf32, #tpu.memory_space<vmem>>, vector<8x128xf32>,
      %c8_i32_25 = arith.constant 8 : i32
      %32 = arith.muli %arg0, %c8_i32_25 : i32
      %33 = tpu.iota {dimensions = array<i32: 0>} : vector<8x1xi32>
      %34 = vector.broadcast %32 : i32 to vector<8x1xi32>
      %35 = arith.addi %34, %33 : vector<8x1xi32>
      %c8_i32_26 = arith.constant 8 : i32
      %36 = vector.broadcast %c8_i32_26 : i32 to vector<8x1xi32>
      %37 = arith.cmpi slt, %35, %36 : vector<8x1xi32>
      %cst_27 = arith.constant 0.000000e+00 : f32
      %38 = vector.shape_cast %37 : vector<8x1xi1> to vector<8x1xi1>
      %39 = vector.broadcast %38 : vector<8x1xi1> to vector<8x128xi1>
      %40 = vector.broadcast %cst_27 : f32 to vector<8x128xf32>
      %41 = arith.select %39, %30, %40 : vector<8x128xi1>, vector<8x128xf32>
      %c0_28 = arith.constant 0 : index
      %c0_29 = arith.constant 0 : index
      %42 = vector.load %arg8[%c0_28, %c0_29] : memref<1x128xf32, #tpu.memory_space<vmem>>, vector<1x128xf32>
      %cst_30 = arith.constant dense<0.000000e+00> : vector<128xf32>
      %43 = vector.multi_reduction <add>, %41, %cst_30 [0] : vector<8x128xf32> to vector<128xf32>
      %44 = vector.shape_cast %43 : vector<128xf32> to vector<1x128xf32>
      %45 = arith.addf %42, %44 : vector<1x128xf32>
      %c0_31 = arith.constant 0 : index
      %c0_32 = arith.constant 0 : index
      %46 = vector.load %arg8[%c0_31, %c0_32] : memref<1x128xf32, #tpu.memory_space<vmem>>, vector<1x128xf32>
      tpu.vector_store %arg8[%c0_31, %c0_32], %45 {strides = array<i32>} : memref<1x128xf32, #tpu.memory_space<vmem>>, vector<1x128xf32>,
      %c0_33 = arith.constant 0 : index
      %c0_34 = arith.constant 0 : index
      %47 = vector.load %arg9[%c0_33, %c0_34] : memref<1x128xf32, #tpu.memory_space<vmem>>, vector<1x128xf32>
      %48 = arith.mulf %41, %41 : vector<8x128xf32>
      %cst_35 = arith.constant dense<0.000000e+00> : vector<128xf32>
      %49 = vector.multi_reduction <add>, %48, %cst_35 [0] : vector<8x128xf32> to vector<128xf32>
      %50 = vector.shape_cast %49 : vector<128xf32> to vector<1x128xf32>
      %51 = arith.addf %47, %50 : vector<1x128xf32>
      %c0_36 = arith.constant 0 : index
      %c0_37 = arith.constant 0 : index
      %52 = vector.load %arg9[%c0_36, %c0_37] : memref<1x128xf32, #tpu.memory_space<vmem>>, vector<1x128xf32>
      tpu.vector_store %arg9[%c0_36, %c0_37], %51 {strides = array<i32>} : memref<1x128xf32, #tpu.memory_space<vmem>>, vector<1x128xf32>,
    } else {
    }
    return
  }
  func.func @transform_0(%arg0: i32, %arg1: i32) -> (i32, i32, i32) {
    %c0_i32 = arith.constant 0 : i32
    %c0_i32_0 = arith.constant 0 : i32
    return %arg1, %arg0, %c0_i32 : i32, i32, i32
  }
  func.func @transform_1(%arg0: i32, %arg1: i32) -> (i32, i32) {
    %c0_i32 = arith.constant 0 : i32
    %c0_i32_0 = arith.constant 0 : i32
    %c0_i32_1 = arith.constant 0 : i32
    return %c0_i32, %c0_i32_0 : i32, i32
  }
  func.func @transform_2(%arg0: i32, %arg1: i32) -> (i32, i32) {
    %c0_i32 = arith.constant 0 : i32
    %c0_i32_0 = arith.constant 0 : i32
    %c0_i32_1 = arith.constant 0 : i32
    return %c0_i32, %c0_i32_0 : i32, i32
  }
  func.func @transform_3(%arg0: i32, %arg1: i32) -> (i32, i32, i32) {
    %c0_i32 = arith.constant 0 : i32
    %c0_i32_0 = arith.constant 0 : i32
    %c0_i32_1 = arith.constant 0 : i32
    return %arg1, %c0_i32, %c0_i32_0 : i32, i32, i32
  }
  func.func @transform_4(%arg0: i32, %arg1: i32) -> (i32, i32) {
    %c0_i32 = arith.constant 0 : i32
    %c0_i32_0 = arith.constant 0 : i32
    %c0_i32_1 = arith.constant 0 : i32
    return %c0_i32, %c0_i32_0 : i32, i32
  }
  func.func @transform_5(%arg0: i32, %arg1: i32) -> (i32, i32) {
    %c0_i32 = arith.constant 0 : i32
    %c0_i32_0 = arith.constant 0 : i32
    return %arg0, %c0_i32 : i32, i32
  }
  func.func @transform_6(%arg0: i32, %arg1: i32) -> (i32, i32) {
    %c0_i32 = arith.constant 0 : i32
    %c0_i32_0 = arith.constant 0 : i32
    %c0_i32_1 = arith.constant 0 : i32
    return %c0_i32, %c0_i32_0 : i32, i32
  }
  func.func @transform_7(%arg0: i32, %arg1: i32) -> (i32, i32) {
    %c0_i32 = arith.constant 0 : i32
    %c0_i32_0 = arith.constant 0 : i32
    %c0_i32_1 = arith.constant 0 : i32
    return %c0_i32, %c0_i32_0 : i32, i32
  }
}

module attributes {stable_mosaic.version = 11 : i64} {
  func.func @_shortcut_kernel(%arg0: i32, %arg1: i32, %arg2: memref<1x40x128xf32, #tpu.memory_space<vmem>>, %arg3: memref<1x128xf32, #tpu.memory_space<vmem>>, %arg4: memref<1x128xf32, #tpu.memory_space<vmem>>, %arg5: memref<128x128xf32, #tpu.memory_space<vmem>>, %arg6: memref<1x128xf32, #tpu.memory_space<vmem>>, %arg7: memref<1x1x128xf32, #tpu.memory_space<vmem>>, %arg8: memref<1x40x128xf32, #tpu.memory_space<vmem>>) attributes {dimension_semantics = [#tpu.dimension_semantics<parallel>, #tpu.dimension_semantics<parallel>], iteration_bounds = array<i64: 2, 1>, scalar_prefetch = 0 : i64, scratch_operands = 0 : i64, tpu.core_type = #tpu.core_type<tc>, window_params = [{transform_indices = @transform_0, window_bounds = array<i64: 1, 40, 128>}, {pipeline_mode = #tpu.pipeline_mode<synchronous>, transform_indices = @transform_1, window_bounds = array<i64: 1, 128>}, {pipeline_mode = #tpu.pipeline_mode<synchronous>, transform_indices = @transform_2, window_bounds = array<i64: 1, 128>}, {pipeline_mode = #tpu.pipeline_mode<synchronous>, transform_indices = @transform_3, window_bounds = array<i64: 128, 128>}, {pipeline_mode = #tpu.pipeline_mode<synchronous>, transform_indices = @transform_4, window_bounds = array<i64: 1, 128>}, {transform_indices = @transform_5, window_bounds = array<i64: 1, 1, 128>}, {transform_indices = @transform_6, window_bounds = array<i64: 1, 40, 128>}]} {
    %c0 = arith.constant 0 : index
    %c0_0 = arith.constant 0 : index
    %c0_1 = arith.constant 0 : index
    %0 = vector.load %arg2[%c0, %c0_0, %c0_1] : memref<1x40x128xf32, #tpu.memory_space<vmem>>, vector<1x40x128xf32>
    %1 = vector.shape_cast %0 : vector<1x40x128xf32> to vector<40x128xf32>
    %c0_2 = arith.constant 0 : index
    %c0_3 = arith.constant 0 : index
    %2 = vector.load %arg3[%c0_2, %c0_3] : memref<1x128xf32, #tpu.memory_space<vmem>>, vector<1x128xf32>
    %3 = vector.broadcast %2 : vector<1x128xf32> to vector<40x128xf32>
    %4 = arith.mulf %1, %3 : vector<40x128xf32>
    %c0_4 = arith.constant 0 : index
    %c0_5 = arith.constant 0 : index
    %5 = vector.load %arg4[%c0_4, %c0_5] : memref<1x128xf32, #tpu.memory_space<vmem>>, vector<1x128xf32>
    %6 = vector.broadcast %5 : vector<1x128xf32> to vector<40x128xf32>
    %7 = arith.addf %4, %6 : vector<40x128xf32>
    %cst = arith.constant 0.000000e+00 : f32
    %8 = vector.broadcast %cst : f32 to vector<40x128xf32>
    %9 = arith.maximumf %7, %8 : vector<40x128xf32>
    %c0_6 = arith.constant 0 : index
    %c0_7 = arith.constant 0 : index
    %10 = vector.load %arg5[%c0_6, %c0_7] : memref<128x128xf32, #tpu.memory_space<vmem>>, vector<128x128xf32>
    %cst_8 = arith.constant dense<0.000000e+00> : vector<40x128xf32>
    %11 = tpu.matmul %9, %10, %cst_8 {dimension_numbers = #tpu.dot_dimension_numbers<[1], [0], [0], [1], [0, 0, 1, 1], [], []>} : vector<40x128xf32>, vector<128x128xf32>, vector<40x128xf32> -> vector<40x128xf32>
    %c0_9 = arith.constant 0 : index
    %c0_10 = arith.constant 0 : index
    %12 = vector.load %arg6[%c0_9, %c0_10] : memref<1x128xf32, #tpu.memory_space<vmem>>, vector<1x128xf32>
    %13 = vector.broadcast %12 : vector<1x128xf32> to vector<40x128xf32>
    %14 = arith.addf %11, %13 : vector<40x128xf32>
    %c0_11 = arith.constant 0 : index
    %c0_12 = arith.constant 0 : index
    %c0_13 = arith.constant 0 : index
    %15 = vector.load %arg7[%c0_11, %c0_12, %c0_13] : memref<1x1x128xf32, #tpu.memory_space<vmem>>, vector<1x1x128xf32>
    %16 = vector.shape_cast %15 : vector<1x1x128xf32> to vector<1x128xf32>
    %17 = vector.broadcast %16 : vector<1x128xf32> to vector<40x128xf32>
    %18 = arith.addf %14, %17 : vector<40x128xf32>
    %c0_14 = arith.constant 0 : index
    %c0_15 = arith.constant 0 : index
    %c0_16 = arith.constant 0 : index
    %19 = vector.load %arg8[%c0_14, %c0_15, %c0_16] : memref<1x40x128xf32, #tpu.memory_space<vmem>>, vector<1x40x128xf32>
    %20 = vector.shape_cast %19 : vector<1x40x128xf32> to vector<40x128xf32>
    %21 = vector.shape_cast %18 : vector<40x128xf32> to vector<1x40x128xf32>
    tpu.vector_store %arg8[%c0_14, %c0_15, %c0_16], %21 {strides = array<i32>} : memref<1x40x128xf32, #tpu.memory_space<vmem>>, vector<1x40x128xf32>,
    return
  }
  func.func @transform_0(%arg0: i32, %arg1: i32) -> (i32, i32, i32) {
    %c0_i32 = arith.constant 0 : i32
    %c0_i32_0 = arith.constant 0 : i32
    return %arg0, %arg1, %c0_i32 : i32, i32, i32
  }
  func.func @transform_1(%arg0: i32, %arg1: i32) -> (i32, i32) {
    %c0_i32 = arith.constant 0 : i32
    %c0_i32_0 = arith.constant 0 : i32
    %c0_i32_1 = arith.constant 0 : i32
    return %c0_i32, %c0_i32_0 : i32, i32
  }
  func.func @transform_2(%arg0: i32, %arg1: i32) -> (i32, i32) {
    %c0_i32 = arith.constant 0 : i32
    %c0_i32_0 = arith.constant 0 : i32
    %c0_i32_1 = arith.constant 0 : i32
    return %c0_i32, %c0_i32_0 : i32, i32
  }
  func.func @transform_3(%arg0: i32, %arg1: i32) -> (i32, i32) {
    %c0_i32 = arith.constant 0 : i32
    %c0_i32_0 = arith.constant 0 : i32
    %c0_i32_1 = arith.constant 0 : i32
    return %c0_i32, %c0_i32_0 : i32, i32
  }
  func.func @transform_4(%arg0: i32, %arg1: i32) -> (i32, i32) {
    %c0_i32 = arith.constant 0 : i32
    %c0_i32_0 = arith.constant 0 : i32
    %c0_i32_1 = arith.constant 0 : i32
    return %c0_i32, %c0_i32_0 : i32, i32
  }
  func.func @transform_5(%arg0: i32, %arg1: i32) -> (i32, i32, i32) {
    %c0_i32 = arith.constant 0 : i32
    %c0_i32_0 = arith.constant 0 : i32
    %c0_i32_1 = arith.constant 0 : i32
    return %arg0, %c0_i32, %c0_i32_0 : i32, i32, i32
  }
  func.func @transform_6(%arg0: i32, %arg1: i32) -> (i32, i32, i32) {
    %c0_i32 = arith.constant 0 : i32
    %c0_i32_0 = arith.constant 0 : i32
    return %arg0, %arg1, %c0_i32 : i32, i32, i32
  }
}

</mosaic_0001>

<bundles_post_ra>
// kernel: _lambda_.5
= control target key start
LH: loop header
LB: loop body
LE: loop exit
PB: predicated region body
PF: predicated region fallthrough
CT: control target
= control target key end

     0   :  { %s317_s0 = inlined_call_operand.vmem [shape: f32[288,128], index: 0, kind: input, shape index: {}]   ;;  %s318_s1 = inlined_call_operand.vmem [shape: f32[1,128], index: 1, kind: output, shape index: {0}]   ;;  %s319_s2 = inlined_call_operand.vmem [shape: f32[1,128], index: 2, kind: output, shape index: {1}]  }
   0x1   :  { %v10_v0 = vld [vmem:[%s317_s0] sm:$0xff]  ;;  %v11_v1 = vld [vmem:[%s317_s0 + $0x8] sm:$0xff]  ;;  %v12_v2 = vld [vmem:[%s317_s0 + $0x10] sm:$0xff] }
   0x2   :  { %v13_v3 = vld [vmem:[%s317_s0 + $0x18] sm:$0xff]  ;;  %v46_v4 = vadd.f32 %v11_v1, %v10_v0  ;;  %v87_v5 = vmul.f32 %v10_v0, %v10_v0  ;;  %v88_v6 = vmul.f32 %v11_v1, %v11_v1  ;;  %v89_v7 = vmul.f32 %v12_v2, %v12_v2  ;;  %v14_v8 = vld [vmem:[%s317_s0 + $0x20] sm:$0xff]  ;;  %v15_v12 = vld [vmem:[%s317_s0 + $0x28] sm:$0xff] }
   0x3   :  { %v90_v10 = vmul.f32 %v13_v3, %v13_v3  ;;  %v91_v14 = vmul.f32 %v14_v8, %v14_v8  ;;  %v16_v16 = vld [vmem:[%s317_s0 + $0x30] sm:$0xff]  ;;  %v92_v18 = vmul.f32 %v15_v12, %v15_v12  ;;  %v17_v20 = vld [vmem:[%s317_s0 + $0x38] sm:$0xff]  ;;  %v18_v24 = vld [vmem:[%s317_s0 + $0x40] sm:$0xff] }
   0x4   :  { %v47_v9 = vadd.f32 %v46_v4, %v12_v2  ;;  %v123_v11 = vadd.f32 %v88_v6, %v87_v5  ;;  %v93_v22 = vmul.f32 %v16_v16, %v16_v16  ;;  %v94_v26 = vmul.f32 %v17_v20, %v17_v20  ;;  %v19_v28 = vld [vmem:[%s317_s0 + $0x48] sm:$0xff]  ;;  %v20_v32 = vld [vmem:[%s317_s0 + $0x50] sm:$0xff]  ;;  %v21_v36 = vld [vmem:[%s317_s0 + $0x58] sm:$0xff] }
   0x5   :  { %v95_v30 = vmul.f32 %v18_v24, %v18_v24  ;;  %v96_v34 = vmul.f32 %v19_v28, %v19_v28  ;;  %v97_v38 = vmul.f32 %v20_v32, %v20_v32  ;;  %v22_v40 = vld [vmem:[%s317_s0 + $0x60] sm:$0xff]  ;;  %v98_v42 = vmul.f32 %v21_v36, %v21_v36  ;;  %v23_v44 = vld [vmem:[%s317_s0 + $0x68] sm:$0xff]  ;;  %v24_v48 = vld [vmem:[%s317_s0 + $0x70] sm:$0xff] }
   0x6   :  { %v48_v13 = vadd.f32 %v47_v9, %v13_v3  ;;  %v124_v15 = vadd.f32 %v123_v11, %v89_v7  ;;  %v99_v46 = vmul.f32 %v22_v40, %v22_v40  ;;  %v100_v50 = vmul.f32 %v23_v44, %v23_v44  ;;  %v25_v52 = vld [vmem:[%s317_s0 + $0x78] sm:$0xff]  ;;  %v26_v56 = vld [vmem:[%s317_s0 + $0x80] sm:$0xff]  ;;  %v27_v60 = vld [vmem:[%s317_s0 + $0x88] sm:$0xff] }
   0x7   :  { %v101_v54 = vmul.f32 %v24_v48, %v24_v48  ;;  %v102_v58 = vmul.f32 %v25_v52, %v25_v52  ;;  %v103_v62 = vmul.f32 %v26_v56, %v26_v56  ;;  %v28_v0 = vld [vmem:[%s317_s0 + $0x90] sm:$0xff]  ;;  %v104_v2 = vmul.f32 %v27_v60, %v27_v60  ;;  %v29_v4 = vld [vmem:[%s317_s0 + $0x98] sm:$0xff] }
   0x8   :  { %v49_v17 = vadd.f32 %v48_v13, %v14_v8  ;;  %v125_v19 = vadd.f32 %v124_v15, %v90_v10  ;;  %v105_v6 = vmul.f32 %v28_v0, %v28_v0  ;;  %v30_v8 = vld [vmem:[%s317_s0 + $0xa0] sm:$0xff]  ;;  %v106_v10 = vmul.f32 %v29_v4, %v29_v4 }
   0xa   :  { %v50_v21 = vadd.f32 %v49_v17, %v15_v12  ;;  %v126_v23 = vadd.f32 %v125_v19, %v91_v14  ;;  %v31_v12 = vld [vmem:[%s317_s0 + $0xa8] sm:$0xff]  ;;  %v107_v14 = vmul.f32 %v30_v8, %v30_v8 }
   0xc   :  { %v51_v25 = vadd.f32 %v50_v21, %v16_v16  ;;  %v127_v27 = vadd.f32 %v126_v23, %v92_v18  ;;  %v32_v16 = vld [vmem:[%s317_s0 + $0xb0] sm:$0xff]  ;;  %v108_v18 = vmul.f32 %v31_v12, %v31_v12 }
   0xe   :  { %v52_v29 = vadd.f32 %v51_v25, %v17_v20  ;;  %v128_v31 = vadd.f32 %v127_v27, %v93_v22  ;;  %v33_v20 = vld [vmem:[%s317_s0 + $0xb8] sm:$0xff]  ;;  %v109_v22 = vmul.f32 %v32_v16, %v32_v16 }
  0x10   :  { %v53_v33 = vadd.f32 %v52_v29, %v18_v24  ;;  %v129_v35 = vadd.f32 %v128_v31, %v94_v26  ;;  %v34_v24 = vld [vmem:[%s317_s0 + $0xc0] sm:$0xff]  ;;  %v110_v26 = vmul.f32 %v33_v20, %v33_v20 }
  0x12   :  { %v54_v37 = vadd.f32 %v53_v33, %v19_v28  ;;  %v130_v39 = vadd.f32 %v129_v35, %v95_v30  ;;  %v35_v28 = vld [vmem:[%s317_s0 + $0xc8] sm:$0xff]  ;;  %v111_v30 = vmul.f32 %v34_v24, %v34_v24 }
  0x14   :  { %v55_v41 = vadd.f32 %v54_v37, %v20_v32  ;;  %v131_v43 = vadd.f32 %v130_v39, %v96_v34  ;;  %v36_v32 = vld [vmem:[%s317_s0 + $0xd0] sm:$0xff]  ;;  %v112_v34 = vmul.f32 %v35_v28, %v35_v28 }
  0x16   :  { %v56_v45 = vadd.f32 %v55_v41, %v21_v36  ;;  %v132_v47 = vadd.f32 %v131_v43, %v97_v38  ;;  %v37_v36 = vld [vmem:[%s317_s0 + $0xd8] sm:$0xff]  ;;  %v113_v38 = vmul.f32 %v36_v32, %v36_v32 }
  0x18   :  { %v57_v49 = vadd.f32 %v56_v45, %v22_v40  ;;  %v133_v51 = vadd.f32 %v132_v47, %v98_v42  ;;  %v38_v40 = vld [vmem:[%s317_s0 + $0xe0] sm:$0xff]  ;;  %v114_v42 = vmul.f32 %v37_v36, %v37_v36 }
  0x1a   :  { %v58_v53 = vadd.f32 %v57_v49, %v23_v44  ;;  %v134_v55 = vadd.f32 %v133_v51, %v99_v46  ;;  %v39_v44 = vld [vmem:[%s317_s0 + $0xe8] sm:$0xff]  ;;  %v115_v46 = vmul.f32 %v38_v40, %v38_v40 }
  0x1c   :  { %v59_v57 = vadd.f32 %v58_v53, %v24_v48  ;;  %v135_v59 = vadd.f32 %v134_v55, %v100_v50  ;;  %v40_v48 = vld [vmem:[%s317_s0 + $0xf0] sm:$0xff]  ;;  %v116_v50 = vmul.f32 %v39_v44, %v39_v44 }
  0x1e   :  { %v60_v61 = vadd.f32 %v59_v57, %v25_v52  ;;  %v136_v63 = vadd.f32 %v135_v59, %v101_v54  ;;  %v41_v52 = vld [vmem:[%s317_s0 + $0xf8] sm:$0xff]  ;;  %v117_v54 = vmul.f32 %v40_v48, %v40_v48 }
  0x20   :  { %v61_v1 = vadd.f32 %v60_v61, %v26_v56  ;;  %v137_v3 = vadd.f32 %v136_v63, %v102_v58  ;;  %v42_v56 = vld [vmem:[%s317_s0 + $0x100] sm:$0xff]  ;;  %v118_v58 = vmul.f32 %v41_v52, %v41_v52 }
  0x22   :  { %v62_v5 = vadd.f32 %v61_v1, %v27_v60  ;;  %v138_v7 = vadd.f32 %v137_v3, %v103_v62  ;;  %v43_v60 = vld [vmem:[%s317_s0 + $0x108] sm:$0xff]  ;;  %v119_v62 = vmul.f32 %v42_v56, %v42_v56 }
  0x24   :  { %v63_v9 = vadd.f32 %v62_v5, %v28_v0  ;;  %v139_v11 = vadd.f32 %v138_v7, %v104_v2  ;;  %v44_v0 = vld [vmem:[%s317_s0 + $0x110] sm:$0xff]  ;;  %v120_v2 = vmul.f32 %v43_v60, %v43_v60 }
  0x26   :  { %v64_v13 = vadd.f32 %v63_v9, %v29_v4  ;;  %v140_v15 = vadd.f32 %v139_v11, %v105_v6  ;;  %v45_v4 = vld [vmem:[%s317_s0 + $0x118] sm:$0xff]  ;;  %v121_v6 = vmul.f32 %v44_v0, %v44_v0 }
  0x27   :  { %v122_v9 = vmul.f32 %v45_v4, %v45_v4 }
  0x28   :  { %v65_v17 = vadd.f32 %v64_v13, %v30_v8  ;;  %v141_v19 = vadd.f32 %v140_v15, %v106_v10 }
  0x2a   :  { %v66_v21 = vadd.f32 %v65_v17, %v31_v12  ;;  %v142_v23 = vadd.f32 %v141_v19, %v107_v14 }
  0x2c   :  { %v67_v25 = vadd.f32 %v66_v21, %v32_v16  ;;  %v143_v27 = vadd.f32 %v142_v23, %v108_v18 }
  0x2e   :  { %v68_v29 = vadd.f32 %v67_v25, %v33_v20  ;;  %v144_v31 = vadd.f32 %v143_v27, %v109_v22 }
  0x30   :  { %v69_v33 = vadd.f32 %v68_v29, %v34_v24  ;;  %v145_v35 = vadd.f32 %v144_v31, %v110_v26 }
  0x32   :  { %v70_v37 = vadd.f32 %v69_v33, %v35_v28  ;;  %v146_v39 = vadd.f32 %v145_v35, %v111_v30 }
  0x34   :  { %v71_v41 = vadd.f32 %v70_v37, %v36_v32  ;;  %v147_v43 = vadd.f32 %v146_v39, %v112_v34 }
  0x36   :  { %v72_v45 = vadd.f32 %v71_v41, %v37_v36  ;;  %v148_v47 = vadd.f32 %v147_v43, %v113_v38 }
  0x38   :  { %v73_v49 = vadd.f32 %v72_v45, %v38_v40  ;;  %v149_v51 = vadd.f32 %v148_v47, %v114_v42 }
  0x3a   :  { %v74_v53 = vadd.f32 %v73_v49, %v39_v44  ;;  %v150_v55 = vadd.f32 %v149_v51, %v115_v46 }
  0x3c   :  { %v75_v57 = vadd.f32 %v74_v53, %v40_v48  ;;  %v151_v59 = vadd.f32 %v150_v55, %v116_v50 }
  0x3e   :  { %v76_v61 = vadd.f32 %v75_v57, %v41_v52  ;;  %v152_v63 = vadd.f32 %v151_v59, %v117_v54 }
  0x40   :  { %v77_v1 = vadd.f32 %v76_v61, %v42_v56  ;;  %v153_v3 = vadd.f32 %v152_v63, %v118_v58 }
  0x42   :  { %v78_v5 = vadd.f32 %v77_v1, %v43_v60  ;;  %v154_v7 = vadd.f32 %v153_v3, %v119_v62 }
  0x44   :  { %v79_v8 = vadd.f32 %v78_v5, %v44_v0  ;;  %v155_v10 = vadd.f32 %v154_v7, %v120_v2 }
  0x46   :  { %v80_v11 = vadd.f32 %v79_v8, %v45_v4  ;;  %v156_v12 = vadd.f32 %v155_v10, %v121_v6 }
  0x48   :  { %v81_v13 = vrot.slane %v80_v11, 4  ;;  %v157_v14 = vadd.f32 %v156_v12, %v122_v9 }
  0x4a   :  { %v82_v15 = vadd.f32 %v81_v13, %v80_v11  ;;  %v158_v16 = vrot.slane %v157_v14, 4 }
  0x4c   :  { %v83_v17 = vrot.slane %v82_v15, 2  ;;  %v159_v18 = vadd.f32 %v158_v16, %v157_v14 }
  0x4e   :  { %v84_v19 = vadd.f32 %v83_v17, %v82_v15  ;;  %v160_v20 = vrot.slane %v159_v18, 2 }
  0x50   :  { %v85_v21 = vrot.slane %v84_v19, 1  ;;  %v161_v22 = vadd.f32 %v160_v20, %v159_v18 }
  0x52   :  { %v86_v23 = vadd.f32 %v85_v21, %v84_v19  ;;  %v162_v24 = vrot.slane %v161_v22, 1 }
  0x54   :  { %168 = vst [vmem:[%s318_s1] sm:$0x1] %v86_v23  ;;  %v163_v25 = vadd.f32 %v162_v24, %v161_v22 }
  0x56   :  { %169 = vst [vmem:[%s319_s2] sm:$0x1] %v163_v25 }

// kernel: _lambda_.6
= control target key start
LH: loop header
LB: loop body
LE: loop exit
PB: predicated region body
PF: predicated region fallthrough
CT: control target
= control target key end

     0   :  { %v458_v0 = vmov 0.0   ;;  %vm459_vm0 = vmmov 0   ;;  %s689_s3 = inlined_call_operand.vmem [shape: f32[128,128], index: 3, kind: input, shape index: {}]   ;;  %s690_s0 = inlined_call_operand.vmem [shape: f32[72,128], index: 0, kind: input, shape index: {}]   ;;  %s691_s1 = inlined_call_operand.vmem [shape: f32[1,128], index: 1, kind: input, shape index: {}]   ;;  %s692_s2 = inlined_call_operand.vmem [shape: f32[1,128], index: 2, kind: input, shape index: {}]   ;;  %s693_s4 = inlined_call_operand.vmem [shape: f32[1,128], index: 4, kind: input, shape index: {}]   ;;  %s694_s5 = inlined_call_operand.vmem [shape: f32[72,128], index: 5, kind: output, shape index: {0}]   ;;  %s695_s6 = inlined_call_operand.vmem [shape: f32[1,128], index: 6, kind: output, shape index: {1}]   ;;  %s696_s7 = inlined_call_operand.vmem [shape: f32[1,128], index: 7, kind: output, shape index: {2}]  }
   0x1   :  { %365 = vmatprep.subr.mxu0 %v458_v0  ;;  %v88_v1 = vld [vmem:[%s689_s3 + $0x78] sm:$0xff]  ;;  %v87_v2 = vld [vmem:[%s689_s3 + $0x70] sm:$0xff]  ;;  %424 = vmatprep.subr.mxu1 %v458_v0  ;;  %v86_v3 = vld [vmem:[%s689_s3 + $0x68] sm:$0xff] }
   0x2   :  { %366 = vmatpush3.msra.mxu0 %v88_v1  ;;  %440 = vmatpush3.msra.mxu1 %v88_v1  ;;  %v85_v4 = vld [vmem:[%s689_s3 + $0x60] sm:$0xff]  ;;  %v84_v5 = vld [vmem:[%s689_s3 + $0x58] sm:$0xff]  ;;  %v83_v6 = vld [vmem:[%s689_s3 + $0x50] sm:$0xff] }
   0x3   :  { %367 = vmatprep.subr.mxu0 %v458_v0  ;;  %425 = vmatprep.subr.mxu1 %v458_v0  ;;  %v82_v7 = vld [vmem:[%s689_s3 + $0x48] sm:$0xff]  ;;  %v81_v8 = vld [vmem:[%s689_s3 + $0x40] sm:$0xff]  ;;  %v80_v9 = vld [vmem:[%s689_s3 + $0x38] sm:$0xff] }
   0x4   :  { %368 = vmatpush3.msra.mxu0 %v87_v2  ;;  %441 = vmatpush3.msra.mxu1 %v87_v2  ;;  %v79_v10 = vld [vmem:[%s689_s3 + $0x30] sm:$0xff]  ;;  %v23_v11 = vld [vmem:[%s690_s0] sm:$0xff]  ;;  %v78_v13 = vld [vmem:[%s689_s3 + $0x28] sm:$0xff] }
   0x5   :  { %369 = vmatprep.subr.mxu0 %v458_v0  ;;  %426 = vmatprep.subr.mxu1 %v458_v0  ;;  %v554_v12 = vld [vmem:[%s691_s1] ss:$0 sm:$0xff]  ;;  %v28_v14 = vld [vmem:[%s690_s0 + $0x28] sm:$0xff]  ;;  %v76_v19 = vld [vmem:[%s689_s3 + $0x18] sm:$0xff] }
   0x6   :  { %370 = vmatpush3.msra.mxu0 %v86_v3  ;;  %442 = vmatpush3.msra.mxu1 %v86_v3  ;;  %v77_v15 = vld [vmem:[%s689_s3 + $0x20] sm:$0xff]  ;;  %v39_v16 = vmul.f32 %v554_v12, %v23_v11  ;;  %v24_v18 = vld [vmem:[%s690_s0 + $0x8] sm:$0xff]  ;;  %v44_v20 = vmul.f32 %v554_v12, %v28_v14  ;;  %v29_v21 = vld [vmem:[%s690_s0 + $0x30] sm:$0xff] }
   0x7   :  { %371 = vmatprep.subr.mxu0 %v458_v0  ;;  %427 = vmatprep.subr.mxu1 %v458_v0  ;;  %v573_v17 = vld [vmem:[%s692_s2] ss:$0 sm:$0xff]  ;;  %v75_v22 = vld [vmem:[%s689_s3 + $0x10] sm:$0xff]  ;;  %v40_v24 = vmul.f32 %v554_v12, %v24_v18  ;;  %v74_v26 = vld [vmem:[%s689_s3 + $0x8] sm:$0xff]  ;;  %v45_v28 = vmul.f32 %v554_v12, %v29_v21 }
   0x8   :  { %372 = vmatpush3.msra.mxu0 %v85_v4  ;;  %443 = vmatpush3.msra.mxu1 %v85_v4  ;;  %v55_v23 = vadd.f32 %v573_v17, %v39_v16  ;;  %v25_v25 = vld [vmem:[%s690_s0 + $0x10] sm:$0xff]  ;;  %v60_v27 = vadd.f32 %v573_v17, %v44_v20  ;;  %v30_v29 = vld [vmem:[%s690_s0 + $0x38] sm:$0xff]  ;;  %v73_v30 = vld [vmem:[%s689_s3] sm:$0xff] }
   0x9   :  { %373 = vmatprep.subr.mxu0 %v458_v0  ;;  %428 = vmatprep.subr.mxu1 %v458_v0  ;;  %v56_v32 = vadd.f32 %v573_v17, %v40_v24  ;;  %v41_v33 = vmul.f32 %v554_v12, %v25_v25  ;;  %v26_v34 = vld [vmem:[%s690_s0 + $0x18] sm:$0xff]  ;;  %v61_v36 = vadd.f32 %v573_v17, %v45_v28  ;;  %v31_v38 = vld [vmem:[%s690_s0 + $0x40] sm:$0xff] }
   0xa   :  { %374 = vmatpush3.msra.mxu0 %v84_v5  ;;  %444 = vmatpush3.msra.mxu1 %v84_v5  ;;  %v64_v31 = vmax.f32 %v55_v23, 0.0  ;;  %v69_v35 = vmax.f32 %v60_v27, 0.0  ;;  %v46_v37 = vmul.f32 %v554_v12, %v30_v29  ;;  %v42_v41 = vmul.f32 %v554_v12, %v26_v34  ;;  %v27_v42 = vld [vmem:[%s690_s0 + $0x20] sm:$0xff] }
   0xb   :  { %375 = vmatprep.subr.mxu0 %v458_v0  ;;  %429 = vmatprep.subr.mxu1 %v458_v0  ;;  %v65_v39 = vmax.f32 %v56_v32, 0.0  ;;  %v57_v40 = vadd.f32 %v573_v17, %v41_v33  ;;  %v70_v43 = vmax.f32 %v61_v36, 0.0  ;;  %v47_v45 = vmul.f32 %v554_v12, %v31_v38  ;;  %v339_v55 = vld [vmem:[%s693_s4] ss:$0 sm:$0xff] }
   0xc   :  { %376 = vmatpush3.msra.mxu0 %v83_v6  ;;  %445 = vmatpush3.msra.mxu1 %v83_v6  ;;  %v62_v44 = vadd.f32 %v573_v17, %v46_v37  ;;  %v58_v47 = vadd.f32 %v573_v17, %v42_v41  ;;  %v43_v48 = vmul.f32 %v554_v12, %v27_v42 }
   0xd   :  { %377 = vmatprep.subr.mxu0 %v458_v0  ;;  %430 = vmatprep.subr.mxu1 %v458_v0  ;;  %v66_v46 = vmax.f32 %v57_v40, 0.0  ;;  %v63_v50 = vadd.f32 %v573_v17, %v47_v45 }
   0xe   :  { %378 = vmatpush3.msra.mxu0 %v82_v7  ;;  %446 = vmatpush3.msra.mxu1 %v82_v7  ;;  %v71_v49 = vmax.f32 %v62_v44, 0.0  ;;  %v67_v51 = vmax.f32 %v58_v47, 0.0  ;;  %v59_v52 = vadd.f32 %v573_v17, %v43_v48 }
   0xf   :  { %379 = vmatprep.subr.mxu0 %v458_v0  ;;  %431 = vmatprep.subr.mxu1 %v458_v0  ;;  %v72_v53 = vmax.f32 %v63_v50, 0.0 }
  0x10   :  { %380 = vmatpush3.msra.mxu0 %v81_v8  ;;  %447 = vmatpush3.msra.mxu1 %v81_v8  ;;  %v68_v54 = vmax.f32 %v59_v52, 0.0 }
  0x11   :  { %381 = vmatprep.subr.mxu0 %v458_v0  ;;  %432 = vmatprep.subr.mxu1 %v458_v0 }
  0x12   :  { %382 = vmatpush3.msra.mxu0 %v80_v9  ;;  %448 = vmatpush3.msra.mxu1 %v80_v9 }
  0x13   :  { %383 = vmatprep.subr.mxu0 %v458_v0  ;;  %433 = vmatprep.subr.mxu1 %v458_v0 }
  0x14   :  { %384 = vmatpush3.msra.mxu0 %v79_v10  ;;  %449 = vmatpush3.msra.mxu1 %v79_v10 }
  0x15   :  { %385 = vmatprep.subr.mxu0 %v458_v0  ;;  %434 = vmatprep.subr.mxu1 %v458_v0 }
  0x16   :  { %386 = vmatpush3.msra.mxu0 %v78_v13  ;;  %450 = vmatpush3.msra.mxu1 %v78_v13 }
  0x17   :  { %387 = vmatprep.subr.mxu0 %v458_v0  ;;  %397 = vmatprep.mubr.msk.f32.mxu0 %vm459_vm0, %v458_v0 }
  0x18   :  { %388 = vmatpush3.msra.mxu0 %v77_v15  ;;  %435 = vmatprep.subr.mxu1 %v458_v0 }
  0x19   :  { %389 = vmatprep.subr.mxu0 %v458_v0  ;;  %451 = vmatpush3.msra.mxu1 %v77_v15 }
  0x1a   :  { %390 = vmatpush3.msra.mxu0 %v76_v19  ;;  %436 = vmatprep.subr.mxu1 %v458_v0 }
  0x1b   :  { %391 = vmatprep.subr.mxu0 %v458_v0  ;;  %452 = vmatpush3.msra.mxu1 %v76_v19 }
  0x1c   :  { %392 = vmatpush3.msra.mxu0 %v75_v22  ;;  %437 = vmatprep.subr.mxu1 %v458_v0 }
  0x1d   :  { %393 = vmatprep.subr.mxu0 %v458_v0  ;;  %453 = vmatpush3.msra.mxu1 %v75_v22 }
  0x1e   :  { %394 = vmatpush3.msra.mxu0 %v74_v26  ;;  %438 = vmatprep.subr.mxu1 %v458_v0 }
  0x1f   :  { %395 = vmatprep.subr.mxu0 %v458_v0  ;;  %454 = vmatpush3.msra.mxu1 %v74_v26 }
  0x20   :  { %396 = vmatpush3.msra.mxu0 %v73_v30  ;;  %439 = vmatprep.subr.mxu1 %v458_v0 }
  0x21   :  { %398 = vmatmul.mubr.f32.vlgmr.msra.gmra.mxu0 %v64_v31  ;;  %455 = vmatpush3.msra.mxu1 %v73_v30 }
  0x22   :  { %400 = vmatprep.mubr.msk.f32.mxu0 %vm459_vm0, %v458_v0  ;;  %412 = vmatprep.mubr.msk.f32.mxu1 %vm459_vm0, %v458_v0 }
  0x23   :  { %413 = vmatmul.mubr.f32.vlgmr.msra.gmra.mxu1 %v69_v35 }
  0x24   :  { %415 = vmatprep.mubr.msk.f32.mxu1 %vm459_vm0, %v458_v0 }
  0x25   :  { %401 = vmatmul.mubr.f32.gmra.mxu0 %v65_v39 }
  0x26   :  { %403 = vmatprep.mubr.msk.f32.mxu0 %vm459_vm0, %v458_v0 }
  0x27   :  { %416 = vmatmul.mubr.f32.gmra.mxu1 %v70_v43 }
  0x28   :  { %418 = vmatprep.mubr.msk.f32.mxu1 %vm459_vm0, %v458_v0 }
  0x29   :  { %404 = vmatmul.mubr.f32.gmra.mxu0 %v66_v46 }
  0x2a   :  { %406 = vmatprep.mubr.msk.f32.mxu0 %vm459_vm0, %v458_v0 }
  0x2b   :  { %419 = vmatmul.mubr.f32.gmra.mxu1 %v71_v49 }
  0x2c   :  { %421 = vmatprep.mubr.msk.f32.mxu1 %vm459_vm0, %v458_v0 }
  0x2d   :  { %407 = vmatmul.mubr.f32.gmra.mxu0 %v67_v51 }
  0x2e   :  { %409 = vmatprep.mubr.msk.f32.mxu0 %vm459_vm0, %v458_v0 }
  0x2f   :  { %422 = vmatmul.mubr.f32.gmra.mxu1 %v72_v53 }
  0x31   :  { %410 = vmatmul.mubr.f32.gmra.mxu0 %v68_v54 }
  0xe1   :  { %v162_v56 = vpop.f32.mrf.mxu0 }
  0xe2   :  { %v163_v57 = vadd.f32 %v339_v55, %v162_v56 }
  0xe3   :  { %v399_v58 = vpop.f32.mrf.mxu0  ;;  %v187_v59 = vpop.f32.mrf.mxu1 }
  0xe4   :  { %206 = vst [vmem:[%s694_s5] sm:$0xff] %v163_v57  ;;  %v188_v60 = vadd.f32 %v339_v55, %v187_v59  ;;  %v286_v12 = vmul.f32 %v163_v57, %v163_v57 }
  0xe5   :  { %v167_v61 = vpop.f32.mrf.mxu0  ;;  %v414_v62 = vpop.f32.mrf.mxu1 }
  0xe6   :  { %v168_v63 = vadd.f32 %v339_v55, %v167_v61  ;;  %211 = vst [vmem:[%s694_s5 + $0x28] sm:$0xff] %v188_v60  ;;  %v291_v31 = vmul.f32 %v188_v60, %v188_v60 }
  0xe7   :  { %v402_v0 = vpop.f32.mrf.mxu0  ;;  %v192_v1 = vpop.f32.mrf.mxu1 }
  0xe8   :  { %207 = vst [vmem:[%s694_s5 + $0x8] sm:$0xff] %v168_v63  ;;  %v193_v2 = vadd.f32 %v339_v55, %v192_v1  ;;  %v287_v8 = vmul.f32 %v168_v63, %v168_v63  ;;  %v272_v13 = vadd.f32 %v168_v63, %v163_v57 }
  0xe9   :  { %v172_v3 = vpop.f32.mrf.mxu0  ;;  %v417_v4 = vpop.f32.mrf.mxu1 }
  0xea   :  { %v173_v5 = vadd.f32 %v339_v55, %v172_v3  ;;  %212 = vst [vmem:[%s694_s5 + $0x30] sm:$0xff] %v193_v2  ;;  %v295_v18 = vadd.f32 %v287_v8, %v286_v12  ;;  %v292_v34 = vmul.f32 %v193_v2, %v193_v2 }
  0xeb   :  { %v405_v6 = vpop.f32.mrf.mxu0  ;;  %v197_v7 = vpop.f32.mrf.mxu1 }
  0xec   :  { %208 = vst [vmem:[%s694_s5 + $0x10] sm:$0xff] %v173_v5  ;;  %v198_v9 = vadd.f32 %v339_v55, %v197_v7  ;;  %v288_v14 = vmul.f32 %v173_v5, %v173_v5  ;;  %v273_v19 = vadd.f32 %v272_v13, %v173_v5 }
  0xed   :  { %v177_v10 = vpop.f32.mrf.mxu0  ;;  %v420_v11 = vpop.f32.mrf.mxu1 }
  0xee   :  { %v178_v15 = vadd.f32 %v339_v55, %v177_v10  ;;  %213 = vst [vmem:[%s694_s5 + $0x38] sm:$0xff] %v198_v9  ;;  %v296_v24 = vadd.f32 %v295_v18, %v288_v14  ;;  %v293_v38 = vmul.f32 %v198_v9, %v198_v9 }
  0xef   :  { %v408_v16 = vpop.f32.mrf.mxu0  ;;  %v202_v17 = vpop.f32.mrf.mxu1 }
  0xf0   :  { %209 = vst [vmem:[%s694_s5 + $0x18] sm:$0xff] %v178_v15  ;;  %v289_v20 = vmul.f32 %v178_v15, %v178_v15  ;;  %v203_v21 = vadd.f32 %v339_v55, %v202_v17  ;;  %v274_v25 = vadd.f32 %v273_v19, %v178_v15 }
  0xf1   :  { %v182_v22 = vpop.f32.mrf.mxu0  ;;  %v423_v23 = vpop.f32.mrf.mxu1 }
  0xf2   :  { %v183_v26 = vadd.f32 %v339_v55, %v182_v22  ;;  %214 = vst [vmem:[%s694_s5 + $0x40] sm:$0xff] %v203_v21  ;;  %v297_v28 = vadd.f32 %v296_v24, %v289_v20  ;;  %v294_v40 = vmul.f32 %v203_v21, %v203_v21 }
  0xf3   :  { %v411_v27 = vpop.f32.mrf.mxu0 }
  0xf4   :  { %210 = vst [vmem:[%s694_s5 + $0x20] sm:$0xff] %v183_v26  ;;  %v275_v29 = vadd.f32 %v274_v25, %v183_v26  ;;  %v290_v30 = vmul.f32 %v183_v26, %v183_v26 }
  0xf6   :  { %v276_v32 = vadd.f32 %v275_v29, %v188_v60  ;;  %v298_v33 = vadd.f32 %v297_v28, %v290_v30 }
  0xf8   :  { %v299_v35 = vadd.f32 %v298_v33, %v291_v31  ;;  %v277_v36 = vadd.f32 %v276_v32, %v193_v2 }
  0xfa   :  { %v278_v37 = vadd.f32 %v277_v36, %v198_v9  ;;  %v300_v39 = vadd.f32 %v299_v35, %v292_v34 }
  0xfc   :  { %v301_v41 = vadd.f32 %v300_v39, %v293_v38  ;;  %v279_v42 = vadd.f32 %v278_v37, %v203_v21 }
  0xfe   :  { %v280_v43 = vrot.slane %v279_v42, 4  ;;  %v302_v44 = vadd.f32 %v301_v41, %v294_v40 }
 0x100   :  { %v281_v45 = vadd.f32 %v280_v43, %v279_v42  ;;  %v303_v46 = vrot.slane %v302_v44, 4 }
 0x102   :  { %v282_v47 = vrot.slane %v281_v45, 2  ;;  %v304_v48 = vadd.f32 %v303_v46, %v302_v44 }
 0x104   :  { %v283_v49 = vadd.f32 %v282_v47, %v281_v45  ;;  %v305_v50 = vrot.slane %v304_v48, 2 }
 0x106   :  { %v284_v51 = vrot.slane %v283_v49, 1  ;;  %v306_v52 = vadd.f32 %v305_v50, %v304_v48 }
 0x108   :  { %v285_v53 = vadd.f32 %v284_v51, %v283_v49  ;;  %v307_v54 = vrot.slane %v306_v52, 1 }
 0x10a   :  { %v308_v55 = vadd.f32 %v307_v54, %v306_v52  ;;  %313 = vst [vmem:[%s695_s6] sm:$0x1] %v285_v53 }
 0x10c   :  { %314 = vst [vmem:[%s696_s7] sm:$0x1] %v308_v55 }

// kernel: _lambda_.8
= control target key start
LH: loop header
LB: loop body
LE: loop exit
PB: predicated region body
PF: predicated region fallthrough
CT: control target
= control target key end

     0   :  { %v193_v0 = vmov 0.0   ;;  %vm194_vm0 = vmmov 0   ;;  %s288_s3 = inlined_call_operand.vmem [shape: f32[128,128], index: 3, kind: input, shape index: {}]   ;;  %s289_s0 = inlined_call_operand.vmem [shape: f32[8,128], index: 0, kind: input, shape index: {}]   ;;  %s290_s1 = inlined_call_operand.vmem [shape: f32[1,128], index: 1, kind: input, shape index: {}]   ;;  %s291_s2 = inlined_call_operand.vmem [shape: f32[1,128], index: 2, kind: input, shape index: {}]   ;;  %s292_s4 = inlined_call_operand.vmem [shape: f32[1,128], index: 4, kind: input, shape index: {}]   ;;  %s293_s5 = inlined_call_operand.vmem [shape: f32[8,128], index: 5, kind: output, shape index: {}]  }
   0x1   :  { %156 = vmatprep.subr.mxu0 %v193_v0  ;;  %v53_v1 = vld [vmem:[%s288_s3 + $0x78] sm:$0xff]  ;;  %v52_v2 = vld [vmem:[%s288_s3 + $0x70] sm:$0xff]  ;;  %188 = vmatprep.mubr.msk.f32.mxu0 %vm194_vm0, %v193_v0  ;;  %v51_v3 = vld [vmem:[%s288_s3 + $0x68] sm:$0xff] }
   0x2   :  { %157 = vmatpush3.msra.mxu0 %v53_v1  ;;  %v50_v4 = vld [vmem:[%s288_s3 + $0x60] sm:$0xff]  ;;  %v49_v5 = vld [vmem:[%s288_s3 + $0x58] sm:$0xff]  ;;  %v48_v6 = vld [vmem:[%s288_s3 + $0x50] sm:$0xff] }
   0x3   :  { %158 = vmatprep.subr.mxu0 %v193_v0  ;;  %v47_v7 = vld [vmem:[%s288_s3 + $0x48] sm:$0xff]  ;;  %v46_v8 = vld [vmem:[%s288_s3 + $0x40] sm:$0xff]  ;;  %v45_v9 = vld [vmem:[%s288_s3 + $0x38] sm:$0xff] }
   0x4   :  { %159 = vmatpush3.msra.mxu0 %v52_v2  ;;  %v44_v10 = vld [vmem:[%s288_s3 + $0x30] sm:$0xff]  ;;  %v20_v11 = vld [vmem:[%s289_s0] sm:$0xff]  ;;  %v43_v13 = vld [vmem:[%s288_s3 + $0x28] sm:$0xff] }
   0x5   :  { %160 = vmatprep.subr.mxu0 %v193_v0  ;;  %v136_v12 = vld [vmem:[%s290_s1] ss:$0 sm:$0xff]  ;;  %v41_v17 = vld [vmem:[%s288_s3 + $0x18] sm:$0xff]  ;;  %v40_v18 = vld [vmem:[%s288_s3 + $0x10] sm:$0xff] }
   0x6   :  { %161 = vmatpush3.msra.mxu0 %v51_v3  ;;  %v42_v14 = vld [vmem:[%s288_s3 + $0x20] sm:$0xff]  ;;  %v28_v15 = vmul.f32 %v136_v12, %v20_v11  ;;  %v39_v20 = vld [vmem:[%s288_s3 + $0x8] sm:$0xff] }
   0x7   :  { %162 = vmatprep.subr.mxu0 %v193_v0  ;;  %v137_v16 = vld [vmem:[%s291_s2] ss:$0 sm:$0xff] }
   0x8   :  { %163 = vmatpush3.msra.mxu0 %v50_v4  ;;  %v36_v19 = vadd.f32 %v137_v16, %v28_v15  ;;  %v38_v21 = vld [vmem:[%s288_s3] sm:$0xff] }
   0x9   :  { %164 = vmatprep.subr.mxu0 %v193_v0  ;;  %v138_v23 = vld [vmem:[%s292_s4] ss:$0 sm:$0xff] }
   0xa   :  { %165 = vmatpush3.msra.mxu0 %v49_v5  ;;  %v37_v22 = vmax.f32 %v36_v19, 0.0 }
   0xb   :  { %166 = vmatprep.subr.mxu0 %v193_v0 }
   0xc   :  { %167 = vmatpush3.msra.mxu0 %v48_v6 }
   0xd   :  { %168 = vmatprep.subr.mxu0 %v193_v0 }
   0xe   :  { %169 = vmatpush3.msra.mxu0 %v47_v7 }
   0xf   :  { %170 = vmatprep.subr.mxu0 %v193_v0 }
  0x10   :  { %171 = vmatpush3.msra.mxu0 %v46_v8 }
  0x11   :  { %172 = vmatprep.subr.mxu0 %v193_v0 }
  0x12   :  { %173 = vmatpush3.msra.mxu0 %v45_v9 }
  0x13   :  { %174 = vmatprep.subr.mxu0 %v193_v0 }
  0x14   :  { %175 = vmatpush3.msra.mxu0 %v44_v10 }
  0x15   :  { %176 = vmatprep.subr.mxu0 %v193_v0 }
  0x16   :  { %177 = vmatpush3.msra.mxu0 %v43_v13 }
  0x17   :  { %178 = vmatprep.subr.mxu0 %v193_v0 }
  0x18   :  { %179 = vmatpush3.msra.mxu0 %v42_v14 }
  0x19   :  { %180 = vmatprep.subr.mxu0 %v193_v0 }
  0x1a   :  { %181 = vmatpush3.msra.mxu0 %v41_v17 }
  0x1b   :  { %182 = vmatprep.subr.mxu0 %v193_v0 }
  0x1c   :  { %183 = vmatpush3.msra.mxu0 %v40_v18 }
  0x1d   :  { %184 = vmatprep.subr.mxu0 %v193_v0 }
  0x1e   :  { %185 = vmatpush3.msra.mxu0 %v39_v20 }
  0x1f   :  { %186 = vmatprep.subr.mxu0 %v193_v0 }
  0x20   :  { %187 = vmatpush3.msra.mxu0 %v38_v21 }
  0x21   :  { %189 = vmatmul.mubr.f32.vlgmr.msra.gmra.mxu0 %v37_v22 }
  0xe1   :  { %v127_v24 = vpop.f32.mrf.mxu0 }
  0xe2   :  { %v128_v25 = vadd.f32 %v138_v23, %v127_v24 }
  0xe3   :  { %v190_v26 = vpop.f32.mrf.mxu0 }
  0xe4   :  { %131 = vst [vmem:[%s293_s5] sm:$0xff] %v128_v25 }

// kernel: _lambda_.7
= control target key start
LH: loop header
LB: loop body
LE: loop exit
PB: predicated region body
PF: predicated region fallthrough
CT: control target
= control target key end

     0   :  { %s725_s24 = smov 0   ;;  %s727_s25 = smov 0   ;;  %s816_s0 = inlined_call_operand.vmem [shape: f32[9,8,128], index: 0, kind: input, shape index: {}]   ;;  %s817_s1 = inlined_call_operand.vmem [shape: f32[1,128], index: 1, kind: input, shape index: {}]   ;;  %s818_s2 = inlined_call_operand.vmem [shape: f32[1,128], index: 2, kind: input, shape index: {}]   ;;  %s819_s3 = inlined_call_operand.vmem [shape: f32[9,128,128], index: 3, kind: input, shape index: {}]   ;;  %s820_s4 = inlined_call_operand.vmem [shape: f32[1,128], index: 4, kind: input, shape index: {}]   ;;  %s821_s5 = inlined_call_operand.vmem [shape: f32[8,128], index: 5, kind: output, shape index: {0}]   ;;  %s822_s6 = inlined_call_operand.vmem [shape: f32[1,128], index: 6, kind: output, shape index: {1}]   ;;  %s823_s7 = inlined_call_operand.vmem [shape: f32[1,128], index: 7, kind: output, shape index: {2}]  }
   0x1   :  { %s729_s26 = smov 0  }
   0x2 LB: > { %s27_s27 = sadd.s32 1, %s675_s25  ;;  %p562_p0 = scmp.ge.s32.totalorder %s679_s26, 1  ;;  %s679_s26 = sphi %s729_s26, %s18_s26   ;;  %s675_s25 = sphi %s727_s25, %s825_s25   ;;  %s671_s24 = sphi %s725_s24, %s824_s24  }
   0x3   : > { %p28_p1 = scmp.ge.s32.totalorder %s27_s27, 9  ;;  %p258_p2 = scmp.lt.s32.totalorder %s679_s26, 10 }
   0x5   : > { %s827_s27 = smov (%p28_p1, %s27_s27), 0  ;;  %p259_p3 = pnand %p562_p0, %p258_p2 }
   0x6   : > { %p296_p4 = scmp.lt.s32.totalorder (!%p259_p3), %s671_s24, 8  ;;  %p331_p5 = scmp.eq.s32.totalorder (!%p259_p3), %s671_s24, 0 }
   0x7   : > { %262 = sbr.rel (%p259_p3) target bundleno = 286 (0x11e), region = 40 }
   0xc   : > { %s297_s28 = scalar_select %p296_p4, %s671_s24, 8  ;;  %v566_v0 = vld [vmem:[%s817_s1] ss:$0 sm:$0xff]  ;;  %v681_v6 = vmov (%p331_p5), 0.0  }
   0xd   : > { %v567_v2 = vld [vmem:[%s818_s2] ss:$0 sm:$0xff]  ;;  %336 = vst [vmem:[%s822_s6] sm:$0x1] (%p331_p5), %v681_v6  ;;  %337 = vst [vmem:[%s823_s7] sm:$0x1] (%p331_p5), %v681_v6 }
   0xe   : > { %s563_s29 = sshll.u32 %s297_s28, 3  ;;  %s575_s30 = sshll.u32 %s297_s28, 7 }
   0xf   : > { %s302_s12 = scalar_lea.vmem %s816_s0, %s563_s29  ;;  %s757_s15 = scalar_lea.vmem %s819_s3, %s575_s30 }
  0x10   : > { %v312_v1 = vld [vmem:[%s302_s12] sm:$0xff] }
  0x11   : > { %v320_v3 = vmul.f32 %v566_v0, %v312_v1  ;;  %335 = sbr.rel (!%p331_p5) target bundleno = 22 (0x16), region = 44 }
  0x13   : > { %v762_v4 = vadd.f32 %v567_v2, %v320_v3 }
  0x15   : > { %v329_v5 = vmax.f32 %v762_v4, 0.0 }
  0x16 PF: > { %p569_p6 = scmp.ne.s32.totalorder %s671_s24, 0 }
  0x18   : > { %340 = sbr.rel (%p569_p6) target bundleno = 31 (0x1f), region = 48 }
  0x1d   : > { %v682_v7 = vmov 0.0  }
  0x1e   : > { %341 = vst [vmem:[#allocation2] sm:$0xff] %v682_v7 }
  0x1f PF: > { %v358_v8 = vld [vmem:[%s757_s15 + $0x78] sm:$0xff]  ;;  %v683_v9 = vmov 0.0   ;;  %v357_v10 = vld [vmem:[%s757_s15 + $0x70] sm:$0xff]  ;;  %vm684_vm0 = vmmov 0   ;;  %v356_v11 = vld [vmem:[%s757_s15 + $0x68] sm:$0xff]  ;;  %p570_p7 = scmp.ne.s32.totalorder %s671_s24, 8 }
  0x20   : > { %594 = vmatprep.subr.mxu0 %v683_v9  ;;  %626 = vmatprep.mubr.msk.f32.mxu0 %vm684_vm0, %v683_v9  ;;  %v355_v12 = vld [vmem:[%s757_s15 + $0x60] sm:$0xff]  ;;  %v354_v13 = vld [vmem:[%s757_s15 + $0x58] sm:$0xff]  ;;  %v353_v14 = vld [vmem:[%s757_s15 + $0x50] sm:$0xff] }
  0x21   : > { %595 = vmatpush3.msra.mxu0 %v358_v8  ;;  %v352_v15 = vld [vmem:[%s757_s15 + $0x48] sm:$0xff]  ;;  %v351_v16 = vld [vmem:[%s757_s15 + $0x40] sm:$0xff]  ;;  %v350_v17 = vld [vmem:[%s757_s15 + $0x38] sm:$0xff] }
  0x22   : > { %596 = vmatprep.subr.mxu0 %v683_v9  ;;  %v349_v18 = vld [vmem:[%s757_s15 + $0x30] sm:$0xff]  ;;  %v348_v19 = vld [vmem:[%s757_s15 + $0x28] sm:$0xff]  ;;  %v347_v20 = vld [vmem:[%s757_s15 + $0x20] sm:$0xff] }
  0x23   : > { %597 = vmatpush3.msra.mxu0 %v357_v10  ;;  %v346_v21 = vld [vmem:[%s757_s15 + $0x18] sm:$0xff]  ;;  %v345_v22 = vld [vmem:[%s757_s15 + $0x10] sm:$0xff]  ;;  %v344_v23 = vld [vmem:[%s757_s15 + $0x8] sm:$0xff] }
  0x24   : > { %598 = vmatprep.subr.mxu0 %v683_v9  ;;  %v343_v24 = vld [vmem:[%s757_s15] sm:$0xff] }
  0x25   : > { %599 = vmatpush3.msra.mxu0 %v356_v11  ;;  %v342_v25 = vld [vmem:[#allocation2] sm:$0xff] }
  0x26   : > { %600 = vmatprep.subr.mxu0 %v683_v9 }
  0x27   : > { %601 = vmatpush3.msra.mxu0 %v355_v12 }
  0x28   : > { %602 = vmatprep.subr.mxu0 %v683_v9 }
  0x29   : > { %603 = vmatpush3.msra.mxu0 %v354_v13 }
  0x2a   : > { %604 = vmatprep.subr.mxu0 %v683_v9 }
  0x2b   : > { %605 = vmatpush3.msra.mxu0 %v353_v14 }
  0x2c   : > { %606 = vmatprep.subr.mxu0 %v683_v9 }
  0x2d   : > { %607 = vmatpush3.msra.mxu0 %v352_v15 }
  0x2e   : > { %608 = vmatprep.subr.mxu0 %v683_v9 }
  0x2f   : > { %609 = vmatpush3.msra.mxu0 %v351_v16 }
  0x30   : > { %610 = vmatprep.subr.mxu0 %v683_v9 }
  0x31   : > { %611 = vmatpush3.msra.mxu0 %v350_v17 }
  0x32   : > { %612 = vmatprep.subr.mxu0 %v683_v9 }
  0x33   : > { %613 = vmatpush3.msra.mxu0 %v349_v18 }
  0x34   : > { %614 = vmatprep.subr.mxu0 %v683_v9 }
  0x35   : > { %615 = vmatpush3.msra.mxu0 %v348_v19 }
  0x36   : > { %616 = vmatprep.subr.mxu0 %v683_v9 }
  0x37   : > { %617 = vmatpush3.msra.mxu0 %v347_v20 }
  0x38   : > { %618 = vmatprep.subr.mxu0 %v683_v9 }
  0x39   : > { %619 = vmatpush3.msra.mxu0 %v346_v21 }
  0x3a   : > { %620 = vmatprep.subr.mxu0 %v683_v9 }
  0x3b   : > { %621 = vmatpush3.msra.mxu0 %v345_v22 }
  0x3c   : > { %622 = vmatprep.subr.mxu0 %v683_v9 }
  0x3d   : > { %623 = vmatpush3.msra.mxu0 %v344_v23 }
  0x3e   : > { %624 = vmatprep.subr.mxu0 %v683_v9 }
  0x3f   : > { %625 = vmatpush3.msra.mxu0 %v343_v24 }
  0x40   : > { %627 = vmatmul.mubr.f32.vlgmr.msra.gmra.mxu0 %v329_v5 }
  0xff   : > { %434 = sbr.rel (%p570_p7) target bundleno = 286 (0x11e), region = 52 }
 0x100   : > { %v425_v26 = vpop.f32.mrf.mxu0 }
 0x101   : > { %v429_v27 = vadd.f32 %v425_v26, %v342_v25 }
 0x102   : > { %v628_v28 = vpop.f32.mrf.mxu0 }
 0x103   : > { %430 = vst [vmem:[#allocation2] sm:$0xff] %v429_v27 }
 0x104   : > { %v571_v30 = vld [vmem:[%s820_s4] ss:$0 sm:$0xff] }
 0x105   : > { %v454_v42 = vld [vmem:[%s822_s6] sm:$0x1] }
 0x106   : > { %v463_v45 = vld [vmem:[%s823_s7] sm:$0x1] }
 0x10a   : > { %v435_v29 = vld [vmem:[#allocation2] sm:$0xff] }
 0x10b   : > { %v443_v31 = vadd.f32 %v571_v30, %v435_v29 }
 0x10d   : > { %444 = vst [vmem:[%s821_s5] sm:$0xff] %v443_v31  ;;  %v455_v32 = vrot.slane %v443_v31, 4  ;;  %v464_v33 = vmul.f32 %v443_v31, %v443_v31 }
 0x10f   : > { %v456_v34 = vadd.f32 %v455_v32, %v443_v31  ;;  %v465_v35 = vrot.slane %v464_v33, 4 }
 0x111   : > { %v457_v36 = vrot.slane %v456_v34, 2  ;;  %v466_v37 = vadd.f32 %v465_v35, %v464_v33 }
 0x113   : > { %v458_v38 = vadd.f32 %v457_v36, %v456_v34  ;;  %v467_v39 = vrot.slane %v466_v37, 2 }
 0x115   : > { %v459_v40 = vrot.slane %v458_v38, 1  ;;  %v468_v41 = vadd.f32 %v467_v39, %v466_v37 }
 0x117   : > { %v460_v43 = vadd.f32 %v459_v40, %v458_v38  ;;  %v469_v44 = vrot.slane %v468_v41, 1 }
 0x119   : > { %v461_v46 = vadd.f32 %v460_v43, %v454_v42  ;;  %v470_v47 = vadd.f32 %v469_v44, %v468_v41 }
 0x11b   : > { %462 = vst [vmem:[%s822_s6] sm:$0x1] %v461_v46  ;;  %v471_v48 = vadd.f32 %v470_v47, %v463_v45 }
 0x11d   : > { %472 = vst [vmem:[%s823_s7] sm:$0x1] %v471_v48 }
 0x11e PF: > { %s18_s26 = sadd.s32 1, %s679_s26   ;;  %s824_s24 = smov %s675_s25 }
 0x11f   : > { %p15_p8 = scmp.ge.s32.totalorder %s18_s26, 11   ;;  %s825_s25 = smov %s827_s27 }
 0x121   :  { %17 = sbr.rel (!%p15_p8) target bundleno = 2 (0x2), region = 101 }

// kernel: _lambda_.9
= control target key start
LH: loop header
LB: loop body
LE: loop exit
PB: predicated region body
PF: predicated region fallthrough
CT: control target
= control target key end

     0   :  { %s766_s21 = smov 0   ;;  %s768_s22 = smov 0   ;;  %s920_s0 = inlined_call_operand.vmem [shape: f32[2,40,128], index: 0, kind: input, shape index: {}]   ;;  %s921_s1 = inlined_call_operand.vmem [shape: f32[1,128], index: 1, kind: input, shape index: {}]   ;;  %s922_s2 = inlined_call_operand.vmem [shape: f32[1,128], index: 2, kind: input, shape index: {}]   ;;  %s923_s3 = inlined_call_operand.vmem [shape: f32[128,128], index: 3, kind: input, shape index: {}]   ;;  %s924_s4 = inlined_call_operand.vmem [shape: f32[1,128], index: 4, kind: input, shape index: {}]   ;;  %s925_s5 = inlined_call_operand.vmem [shape: f32[2,1,128], index: 5, kind: input, shape index: {}]   ;;  %s926_s6 = inlined_call_operand.vmem [shape: f32[2,40,128], index: 6, kind: output, shape index: {}]  }
   0x1   :  { %s770_s23 = smov 0  }
   0x2 LB: > { %s28_s24 = sadd.s32 1, %s723_s22  ;;  %p569_p0 = scmp.ge.s32.totalorder %s727_s23, 1  ;;  %s727_s23 = sphi %s770_s23, %s16_s23   ;;  %s723_s22 = sphi %s768_s22, %s928_s22   ;;  %s719_s21 = sphi %s766_s21, %s927_s21  }
   0x3   : > { %p30_p1 = scmp.ge.s32.totalorder %s28_s24, 2  ;;  %p241_p2 = scmp.lt.s32.totalorder %s727_s23, 3 }
   0x5   : > { %s930_s24 = smov (%p30_p1, %s28_s24), 0  ;;  %p242_p3 = pnand %p569_p0, %p241_p2 }
   0x6   : > { %p283_p4 = scmp.lt.s32.totalorder (!%p242_p3), %s719_s21, 1 }
   0x7   : > { %245 = sbr.rel (%p242_p3) target bundleno = 251 (0xfb), region = 44 }
   0xc   : > { %v354_v0 = vld [vmem:[%s923_s3 + $0x78] sm:$0xff]  ;;  %v729_v1 = vmov 0.0   ;;  %v353_v2 = vld [vmem:[%s923_s3 + $0x70] sm:$0xff]  ;;  %v352_v3 = vld [vmem:[%s923_s3 + $0x68] sm:$0xff]  ;;  %s932_s21 = smov (!%p283_p4, %s719_s21), 1  ;;  %vm730_vm0 = vmmov 0  }
   0xd   : > { %599 = vmatprep.subr.mxu0 %v729_v1  ;;  %646 = vmatprep.subr.mxu1 %v729_v1  ;;  %v351_v4 = vld [vmem:[%s923_s3 + $0x60] sm:$0xff]  ;;  %v350_v5 = vld [vmem:[%s923_s3 + $0x58] sm:$0xff]  ;;  %v349_v6 = vld [vmem:[%s923_s3 + $0x50] sm:$0xff]  ;;  %s678_s15 = smul.u32 40, %s932_s21  ;;  %s294_s28 = scalar_lea.vmem %s925_s5, %s932_s21 }
   0xe   : > { %600 = vmatpush3.msra.mxu0 %v354_v0  ;;  %662 = vmatpush3.msra.mxu1 %v354_v0  ;;  %v348_v7 = vld [vmem:[%s923_s3 + $0x48] sm:$0xff]  ;;  %v347_v8 = vld [vmem:[%s923_s3 + $0x40] sm:$0xff]  ;;  %v346_v9 = vld [vmem:[%s923_s3 + $0x38] sm:$0xff] }
   0xf   : > { %601 = vmatprep.subr.mxu0 %v729_v1  ;;  %647 = vmatprep.subr.mxu1 %v729_v1  ;;  %s839_s26 = scalar_lea.vmem %s920_s0, %s678_s15  ;;  %v345_v10 = vld [vmem:[%s923_s3 + $0x30] sm:$0xff]  ;;  %v572_v12 = vld [vmem:[%s921_s1] ss:$0 sm:$0xff]  ;;  %v344_v13 = vld [vmem:[%s923_s3 + $0x28] sm:$0xff]  ;;  %s303_s9 = scalar_lea.vmem %s926_s6, %s678_s15 }
  0x10   : > { %602 = vmatpush3.msra.mxu0 %v353_v2  ;;  %663 = vmatpush3.msra.mxu1 %v353_v2  ;;  %v305_v11 = vld [vmem:[%s839_s26] sm:$0xff]  ;;  %v308_v14 = vld [vmem:[%s839_s26 + $0x18] sm:$0xff]  ;;  %v306_v18 = vld [vmem:[%s839_s26 + $0x8] sm:$0xff] }
  0x11   : > { %603 = vmatprep.subr.mxu0 %v729_v1  ;;  %648 = vmatprep.subr.mxu1 %v729_v1  ;;  %v343_v15 = vld [vmem:[%s923_s3 + $0x20] sm:$0xff]  ;;  %v317_v16 = vmul.f32 %v572_v12, %v305_v11  ;;  %v342_v19 = vld [vmem:[%s923_s3 + $0x18] sm:$0xff]  ;;  %v320_v20 = vmul.f32 %v572_v12, %v308_v14  ;;  %v341_v22 = vld [vmem:[%s923_s3 + $0x10] sm:$0xff]  ;;  %v318_v24 = vmul.f32 %v572_v12, %v306_v18 }
  0x12   : > { %604 = vmatpush3.msra.mxu0 %v352_v3  ;;  %664 = vmatpush3.msra.mxu1 %v352_v3  ;;  %v573_v17 = vld [vmem:[%s922_s2] ss:$0 sm:$0xff]  ;;  %v307_v25 = vld [vmem:[%s839_s26 + $0x10] sm:$0xff]  ;;  %v340_v26 = vld [vmem:[%s923_s3 + $0x8] sm:$0xff] }
  0x13   : > { %605 = vmatprep.subr.mxu0 %v729_v1  ;;  %649 = vmatprep.subr.mxu1 %v729_v1  ;;  %v309_v21 = vld [vmem:[%s839_s26 + $0x20] sm:$0xff]  ;;  %v329_v23 = vadd.f32 %v573_v17, %v317_v16  ;;  %v332_v27 = vadd.f32 %v573_v17, %v320_v20  ;;  %v330_v31 = vadd.f32 %v573_v17, %v318_v24 }
  0x14   : > { %606 = vmatpush3.msra.mxu0 %v351_v4  ;;  %665 = vmatpush3.msra.mxu1 %v351_v4  ;;  %v321_v28 = vmul.f32 %v572_v12, %v309_v21  ;;  %v339_v29 = vld [vmem:[%s923_s3] sm:$0xff]  ;;  %v319_v32 = vmul.f32 %v572_v12, %v307_v25 }
  0x15   : > { %607 = vmatprep.subr.mxu0 %v729_v1  ;;  %650 = vmatprep.subr.mxu1 %v729_v1  ;;  %v334_v30 = vmax.f32 %v329_v23, 0.0  ;;  %v337_v33 = vmax.f32 %v332_v27, 0.0  ;;  %v335_v35 = vmax.f32 %v330_v31, 0.0  ;;  %v574_v39 = vld [vmem:[%s924_s4] ss:$0 sm:$0xff] }
  0x16   : > { %608 = vmatpush3.msra.mxu0 %v350_v5  ;;  %666 = vmatpush3.msra.mxu1 %v350_v5  ;;  %v333_v34 = vadd.f32 %v573_v17, %v321_v28  ;;  %v331_v36 = vadd.f32 %v573_v17, %v319_v32  ;;  %v575_v41 = vld [vmem:[%s294_s28] ss:$0 sm:$0xff] }
  0x17   : > { %609 = vmatprep.subr.mxu0 %v729_v1  ;;  %651 = vmatprep.subr.mxu1 %v729_v1 }
  0x18   : > { %610 = vmatpush3.msra.mxu0 %v349_v6  ;;  %667 = vmatpush3.msra.mxu1 %v349_v6  ;;  %v338_v37 = vmax.f32 %v333_v34, 0.0  ;;  %v336_v38 = vmax.f32 %v331_v36, 0.0 }
  0x19   : > { %611 = vmatprep.subr.mxu0 %v729_v1  ;;  %652 = vmatprep.subr.mxu1 %v729_v1 }
  0x1a   : > { %612 = vmatpush3.msra.mxu0 %v348_v7  ;;  %668 = vmatpush3.msra.mxu1 %v348_v7 }
  0x1b   : > { %613 = vmatprep.subr.mxu0 %v729_v1  ;;  %653 = vmatprep.subr.mxu1 %v729_v1 }
  0x1c   : > { %614 = vmatpush3.msra.mxu0 %v347_v8  ;;  %669 = vmatpush3.msra.mxu1 %v347_v8 }
  0x1d   : > { %615 = vmatprep.subr.mxu0 %v729_v1  ;;  %654 = vmatprep.subr.mxu1 %v729_v1 }
  0x1e   : > { %616 = vmatpush3.msra.mxu0 %v346_v9  ;;  %670 = vmatpush3.msra.mxu1 %v346_v9 }
  0x1f   : > { %617 = vmatprep.subr.mxu0 %v729_v1  ;;  %655 = vmatprep.subr.mxu1 %v729_v1 }
  0x20   : > { %618 = vmatpush3.msra.mxu0 %v345_v10  ;;  %671 = vmatpush3.msra.mxu1 %v345_v10 }
  0x21   : > { %619 = vmatprep.subr.mxu0 %v729_v1  ;;  %656 = vmatprep.subr.mxu1 %v729_v1 }
  0x22   : > { %620 = vmatpush3.msra.mxu0 %v344_v13  ;;  %672 = vmatpush3.msra.mxu1 %v344_v13 }
  0x23   : > { %621 = vmatprep.subr.mxu0 %v729_v1  ;;  %657 = vmatprep.subr.mxu1 %v729_v1 }
  0x24   : > { %622 = vmatpush3.msra.mxu0 %v343_v15  ;;  %673 = vmatpush3.msra.mxu1 %v343_v15 }
  0x25   : > { %623 = vmatprep.subr.mxu0 %v729_v1  ;;  %658 = vmatprep.subr.mxu1 %v729_v1 }
  0x26   : > { %624 = vmatpush3.msra.mxu0 %v342_v19  ;;  %674 = vmatpush3.msra.mxu1 %v342_v19 }
  0x27   : > { %625 = vmatprep.subr.mxu0 %v729_v1  ;;  %659 = vmatprep.subr.mxu1 %v729_v1 }
  0x28   : > { %626 = vmatpush3.msra.mxu0 %v341_v22  ;;  %675 = vmatpush3.msra.mxu1 %v341_v22 }
  0x29   : > { %627 = vmatprep.subr.mxu0 %v729_v1  ;;  %660 = vmatprep.subr.mxu1 %v729_v1 }
  0x2a   : > { %628 = vmatpush3.msra.mxu0 %v340_v26  ;;  %676 = vmatpush3.msra.mxu1 %v340_v26 }
  0x2b   : > { %629 = vmatprep.subr.mxu0 %v729_v1  ;;  %631 = vmatprep.mubr.msk.f32.mxu0 %vm730_vm0, %v729_v1 }
  0x2c   : > { %630 = vmatpush3.msra.mxu0 %v339_v29  ;;  %661 = vmatprep.subr.mxu1 %v729_v1 }
  0x2d   : > { %632 = vmatmul.mubr.f32.vlgmr.msra.gmra.mxu0 %v334_v30  ;;  %677 = vmatpush3.msra.mxu1 %v339_v29 }
  0x2e   : > { %640 = vmatprep.mubr.msk.f32.mxu1 %vm730_vm0, %v729_v1  ;;  %634 = vmatprep.mubr.msk.f32.mxu0 %vm730_vm0, %v729_v1 }
  0x2f   : > { %641 = vmatmul.mubr.f32.vlgmr.msra.gmra.mxu1 %v337_v33 }
  0x30   : > { %643 = vmatprep.mubr.msk.f32.mxu1 %vm730_vm0, %v729_v1 }
  0x31   : > { %635 = vmatmul.mubr.f32.gmra.mxu0 %v335_v35 }
  0x32   : > { %637 = vmatprep.mubr.msk.f32.mxu0 %vm730_vm0, %v729_v1 }
  0x33   : > { %644 = vmatmul.mubr.f32.gmra.mxu1 %v338_v37 }
  0x35   : > { %638 = vmatmul.mubr.f32.gmra.mxu0 %v336_v38 }
  0xed   : > { %v428_v40 = vpop.f32.mrf.mxu0 }
  0xee   : > { %v429_v42 = vadd.f32 %v574_v39, %v428_v40 }
  0xef   : > { %v633_v43 = vpop.f32.mrf.mxu0  ;;  %v443_v44 = vpop.f32.mrf.mxu1 }
  0xf0   : > { %v459_v45 = vadd.f32 %v575_v41, %v429_v42  ;;  %v444_v46 = vadd.f32 %v574_v39, %v443_v44 }
  0xf1   : > { %v433_v47 = vpop.f32.mrf.mxu0  ;;  %v642_v48 = vpop.f32.mrf.mxu1 }
  0xf2   : > { %464 = vst [vmem:[%s303_s9] sm:$0xff] %v459_v45  ;;  %v462_v49 = vadd.f32 %v575_v41, %v444_v46  ;;  %v434_v50 = vadd.f32 %v574_v39, %v433_v47 }
  0xf3   : > { %v636_v51 = vpop.f32.mrf.mxu0  ;;  %v448_v52 = vpop.f32.mrf.mxu1 }
  0xf4   : > { %467 = vst [vmem:[%s303_s9 + $0x18] sm:$0xff] %v462_v49  ;;  %v460_v53 = vadd.f32 %v575_v41, %v434_v50  ;;  %v449_v54 = vadd.f32 %v574_v39, %v448_v52 }
  0xf5   : > { %v438_v55 = vpop.f32.mrf.mxu0  ;;  %v645_v56 = vpop.f32.mrf.mxu1 }
  0xf6   : > { %465 = vst [vmem:[%s303_s9 + $0x8] sm:$0xff] %v460_v53  ;;  %v463_v57 = vadd.f32 %v575_v41, %v449_v54  ;;  %v439_v58 = vadd.f32 %v574_v39, %v438_v55 }
  0xf7   : > { %v639_v59 = vpop.f32.mrf.mxu0 }
  0xf8   : > { %468 = vst [vmem:[%s303_s9 + $0x20] sm:$0xff] %v463_v57  ;;  %v461_v60 = vadd.f32 %v575_v41, %v439_v58 }
  0xfa   : > { %466 = vst [vmem:[%s303_s9 + $0x10] sm:$0xff] %v461_v60 }
  0xfb PF: > { %s16_s23 = sadd.s32 1, %s727_s23   ;;  %s927_s21 = smov %s723_s22 }
  0xfc   : > { %p13_p5 = scmp.ge.s32.totalorder %s16_s23, 4   ;;  %s928_s22 = smov %s930_s24 }
  0xfe   :  { %15 = sbr.rel (!%p13_p5) target bundleno = 2 (0x2), region = 77 }

</bundles_post_ra>
